<compile_context>
chip_gen: v5e
topology: v5e:2x2
jax: 0.10.0
libtpu: 0.0.40
codegen_flags: <defaults>
</compile_context>

<pallas_src>
import functools

import jax
import jax.numpy as jnp
from jax import lax
from jax.experimental import pallas as pl
from jax.experimental.pallas import tpu as pltpu


# ---------------------------------------------------------------------------
# In-kernel helpers (traced inside the Pallas kernel body)
# ---------------------------------------------------------------------------
def _gelu(x):
    # TODO(synk): PyTorch nn.GELU() default is the exact erf form; tanh approximation is
    # used since exact-erf lowering on Mosaic is not guaranteed (~1e-3 drift).
    c = 0.7978845608028654  # sqrt(2/pi)
    return 0.5 * x * (1.0 + jnp.tanh(c * (x + 0.044715 * x * x * x)))


def _projection_head(x, w_proj, b_proj, w_fc, b_fc, gamma, beta):
    """nn.Linear -> GELU -> nn.Linear -> (dropout=identity) -> residual -> LayerNorm.

    Weights arrive as bf16 tiles; matmul operands are bf16, accumulation is f32,
    all pointwise / LayerNorm math stays f32.
    """
    projected = jnp.dot(x.astype(jnp.bfloat16), w_proj,
                        preferred_element_type=jnp.float32) + b_proj
    h = _gelu(projected)
    h = jnp.dot(h.astype(jnp.bfloat16), w_fc,
                preferred_element_type=jnp.float32) + b_fc
    # TODO(synk): nn.Dropout(0.1) treated as identity (eval-mode / deterministic).
    h = h + projected
    # Fused LayerNorm statistics: single pass, var = E[h^2] - mu^2.
    inv_d = 1.0 / h.shape[-1]
    mu = jnp.sum(h, axis=-1, keepdims=True) * inv_d
    msq = jnp.sum(h * h, axis=-1, keepdims=True) * inv_d
    var = msq - mu * mu
    h_norm = (h - mu) * lax.rsqrt(var + 1e-5)
    return h_norm * gamma + beta


def _logsumexp_rows(x):
    m = jnp.max(x, axis=-1, keepdims=True)
    return m + jnp.log(jnp.sum(jnp.exp(x - m), axis=-1, keepdims=True))


# ---------------------------------------------------------------------------
# Pallas kernel: grid=(2,) over {image, text} heads + CLIP symmetric CE loss
# ---------------------------------------------------------------------------
def clip_kernel(feat_ref, w_ref, vec_ref, loss_ref, img_emb_ref, *, temperature):
    head = pl.program_id(0)
    n, e = feat_ref.shape            # (B, E)
    inv_temp = 1.0 / temperature     # constant multiply instead of VPU divide
    half_temp = 0.5 * temperature

    # Packed parameter slabs (one DMA each):
    #   w_ref  : (E+P, P) bf16 -> rows [0:E] = projection weight, rows [E:] = fc weight
    #   vec_ref: (4,  P) f32   -> rows [b_proj, b_fc, ln_gamma, ln_beta]
    w_proj = w_ref[0:e, :]
    w_fc = w_ref[e:, :]
    b_proj = vec_ref[0:1, :]
    b_fc = vec_ref[1:2, :]
    gamma = vec_ref[2:3, :]
    beta = vec_ref[3:4, :]

    emb = _projection_head(feat_ref[...], w_proj, b_proj, w_fc, b_fc, gamma, beta)

    @pl.when(head == 0)
    def _():
        # Image-head step: park embeddings in VMEM scratch for the final step.
        img_emb_ref[...] = emb

    @pl.when(head == pl.num_programs(0) - 1)
    def _():
        image_embeddings = img_emb_ref[...]
        text_embeddings = emb

        contract_last = (((1,), (1,)), ((), ()))    # A @ B.T without explicit transpose
        contract_inner = (((1,), (0,)), ((), ()))   # plain A @ B

        # logits and logits.T both produced directly on the MXU -> all softmax
        # reductions below are lane-wise (no axis-0 / cross-sublane softmax).
        logits = lax.dot_general(text_embeddings, image_embeddings, contract_last,
                                 preferred_element_type=jnp.float32) * inv_temp
        logits_t = lax.dot_general(image_embeddings, text_embeddings, contract_last,
                                   preferred_element_type=jnp.float32) * inv_temp

        # images_similarity + texts_similarity fused into a single MXU op:
        # [img | txt] @ [img | txt].T == img@img.T + txt@txt.T
        cat = jnp.concatenate([image_embeddings, text_embeddings], axis=-1)
        s = lax.dot_general(cat, cat, contract_last,
                            preferred_element_type=jnp.float32) * half_temp

        # targets = softmax((images_similarity + texts_similarity) / 2 * T, dim=-1)
        s_max = jnp.max(s, axis=-1, keepdims=True)
        s_exp = jnp.exp(s - s_max)
        # EUP approximate reciprocal (~1e-4 rel. error); use approx=False for parity.
        targets = s_exp * pl.reciprocal(jnp.sum(s_exp, axis=-1, keepdims=True),
                                        approx=True)

        # texts_loss_sum  = sum_ij -targets[i,j] * (logits[i,j] - lse_row[i])
        # images_loss_sum = sum_ij -targets[j,i] * (logits[j,i] - lse_t[i])
        #   where lse_t[i] = logsumexp_j logits_t[i,j]  (== column logsumexp of logits)
        # Combined: sum(-targets * (ls_row + logits)) + sum(targets @ lse_t)
        ls_row = logits - _logsumexp_rows(logits)        # (B,B), lane-wise
        lse_t = _logsumexp_rows(logits_t)                # (B,1), lane-wise

        per_row = jnp.sum(-targets * (ls_row + logits), axis=-1, keepdims=True)  # (B,1)
        per_row = per_row + lax.dot_general(targets, lse_t, contract_inner,
                                            preferred_element_type=jnp.float32)  # (B,1)
        total = jnp.sum(per_row, axis=0, keepdims=True)                          # (1,1)

        # mean((texts_loss + images_loss)/2) == total / (2*B)
        loss_ref[0, 0] = total[0, 0] * (1.0 / (2.0 * n))


# ---------------------------------------------------------------------------
# Wrapper
# ---------------------------------------------------------------------------
def clip_loss(image_features, text_features, image_params, text_params,
              temperature=1.0):
    b, e = image_features.shape
    p = image_params[0].shape[1]

    def pack(params):
        w_proj, b_proj, w_fc, b_fc, gamma, beta = params
        w = jnp.concatenate([w_proj.astype(jnp.bfloat16),
                             w_fc.astype(jnp.bfloat16)], axis=0)   # (E+P, P) bf16
        v = jnp.concatenate([b_proj, b_fc, gamma, beta], axis=0)   # (4, P)   f32
        return w, v

    w_img, v_img = pack(image_params)
    w_txt, v_txt = pack(text_params)

    feats = jnp.stack([image_features, text_features])     # (2, B, E)    f32
    weights = jnp.stack([w_img, w_txt])                    # (2, E+P, P)  bf16
    vectors = jnp.stack([v_img, v_txt])                    # (2, 4, P)    f32

    grid_spec = pltpu.PrefetchScalarGridSpec(
        num_scalar_prefetch=0,
        grid=(2,),                                          # head 0 = image, 1 = text
        in_specs=[
            pl.BlockSpec((None, b, e), lambda h: (h, 0, 0)),
            pl.BlockSpec((None, e + p, p), lambda h: (h, 0, 0)),
            pl.BlockSpec((None, 4, p), lambda h: (h, 0, 0)),
        ],
        # Scalar loss straight to SMEM: no lane-sparse VMEM store / writeback DMA.
        out_specs=pl.BlockSpec(memory_space=pltpu.MemorySpace.SMEM),
        scratch_shapes=[pltpu.VMEM((b, p), jnp.float32)],   # image embeddings carry
    )

    flops = (2 * (2 * b * e * p + 2 * b * p * p)   # two projection heads
             + 2 * (2 * b * b * p)                 # logits + logits.T
             + 2 * b * b * (2 * p)                 # fused similarity matmul
             + 2 * b * b)                          # targets @ lse_t
    transcendentals = 2 * b * p + 4 * b * b + 4 * b
    bytes_accessed = (feats.size * 4 + weights.size * 2 + vectors.size * 4 + 4)

    loss = pl.pallas_call(
        functools.partial(clip_kernel, temperature=float(temperature)),
        out_shape=jax.ShapeDtypeStruct((1, 1), jnp.float32),
        grid_spec=grid_spec,
        compiler_params=pltpu.CompilerParams(
            # Step 1 consumes step-0 scratch (image embeddings) -> not core-parallel.
            dimension_semantics=("arbitrary",),
            vmem_limit_bytes=8 << 20),
        cost_estimate=pl.CostEstimate(flops=flops,
                                      transcendentals=transcendentals,
                                      bytes_accessed=bytes_accessed),
    )(feats, weights, vectors)
    return loss[0, 0]


# ---------------------------------------------------------------------------
# Deterministic parameter construction (matches ProjectionHead shapes)
# ---------------------------------------------------------------------------
def init_projection_head(key, embedding_dim, projection_dim):
    k1, k2 = jax.random.split(key)
    # Weights stored already-transposed ([in, out]) and in bf16: halves the HBM bytes
    # that dominate this kernel and feeds the MXU at its bf16 rate.
    w_proj = (0.02 * jax.random.normal(k1, (embedding_dim, projection_dim),
                                       jnp.float32)).astype(jnp.bfloat16)
    b_proj = jnp.zeros((1, projection_dim), jnp.float32)
    w_fc = (0.02 * jax.random.normal(k2, (projection_dim, projection_dim),
                                     jnp.float32)).astype(jnp.bfloat16)
    b_fc = jnp.zeros((1, projection_dim), jnp.float32)
    gamma = jnp.ones((1, projection_dim), jnp.float32)   # LayerNorm weight
    beta = jnp.zeros((1, projection_dim), jnp.float32)   # LayerNorm bias
    return (w_proj, b_proj, w_fc, b_fc, gamma, beta)


if __name__ == "__main__":
    B = 16           # >= 16 so the bf16 LHS cast does not sublane-pad (bf16 tile (16,128))
    E = 512          # image_embedding / text_embedding (module default)
    P = 256          # projection_dim (module default)
    TEMPERATURE = 1.0

    key = jax.random.PRNGKey(0)
    k_img, k_txt, k_ip, k_tp = jax.random.split(key, 4)

    # Encoder output features (stand-in for ResNet-18 outputs; see TODO above).
    image_features = jax.random.normal(k_img, (B, E), jnp.float32)
    text_features = jax.random.normal(k_txt, (B, E), jnp.float32)

    image_params = init_projection_head(k_ip, E, P)
    text_params = init_projection_head(k_tp, E, P)

    loss = clip_loss(image_features, text_features, image_params, text_params,
                     temperature=TEMPERATURE)
    jax.block_until_ready(loss)
    assert jnp.isfinite(loss), f"non-finite loss: {loss}"
    print("KERNEL_OK")
</pallas_src>

<mosaic_0001>
module attributes {stable_mosaic.version = 11 : i64} {
  func.func @clip_kernel(%arg0: i32, %arg1: memref<1x16x512xf32, #tpu.memory_space<vmem>>, %arg2: memref<1x768x256xbf16, #tpu.memory_space<vmem>>, %arg3: memref<1x4x256xf32, #tpu.memory_space<vmem>>, %arg4: memref<1x1xf32, #tpu.memory_space<smem>>, %arg5: memref<16x256xf32, #tpu.memory_space<vmem>>) attributes {dimension_semantics = [#tpu.dimension_semantics<arbitrary>], iteration_bounds = array<i64: 2>, scalar_prefetch = 0 : i64, scratch_operands = 1 : i64, tpu.core_type = #tpu.core_type<tc>, window_params = [{transform_indices = @transform_0, window_bounds = array<i64: 1, 16, 512>}, {transform_indices = @transform_1, window_bounds = array<i64: 1, 768, 256>}, {transform_indices = @transform_2, window_bounds = array<i64: 1, 4, 256>}, {transform_indices = @transform_3, window_bounds = array<i64: 1, 1>}]} {
    %c0 = arith.constant 0 : index
    %c0_0 = arith.constant 0 : index
    %c0_1 = arith.constant 0 : index
    %0 = vector.load %arg2[%c0, %c0_0, %c0_1] : memref<1x768x256xbf16, #tpu.memory_space<vmem>>, vector<1x512x256xbf16>
    %1 = vector.shape_cast %0 : vector<1x512x256xbf16> to vector<512x256xbf16>
    %c0_2 = arith.constant 0 : index
    %c512 = arith.constant 512 : index
    %c0_3 = arith.constant 0 : index
    %2 = vector.load %arg2[%c0_2, %c512, %c0_3] : memref<1x768x256xbf16, #tpu.memory_space<vmem>>, vector<1x256x256xbf16>
    %3 = vector.shape_cast %2 : vector<1x256x256xbf16> to vector<256x256xbf16>
    %c0_4 = arith.constant 0 : index
    %c0_5 = arith.constant 0 : index
    %c0_6 = arith.constant 0 : index
    %4 = vector.load %arg3[%c0_4, %c0_5, %c0_6] : memref<1x4x256xf32, #tpu.memory_space<vmem>>, vector<1x1x256xf32>
    %5 = vector.shape_cast %4 : vector<1x1x256xf32> to vector<1x256xf32>
    %c0_7 = arith.constant 0 : index
    %c1 = arith.constant 1 : index
    %c0_8 = arith.constant 0 : index
    %6 = vector.load %arg3[%c0_7, %c1, %c0_8] : memref<1x4x256xf32, #tpu.memory_space<vmem>>, vector<1x1x256xf32>
    %7 = vector.shape_cast %6 : vector<1x1x256xf32> to vector<1x256xf32>
    %c0_9 = arith.constant 0 : index
    %c2 = arith.constant 2 : index
    %c0_10 = arith.constant 0 : index
    %8 = vector.load %arg3[%c0_9, %c2, %c0_10] : memref<1x4x256xf32, #tpu.memory_space<vmem>>, vector<1x1x256xf32>
    %9 = vector.shape_cast %8 : vector<1x1x256xf32> to vector<1x256xf32>
    %c0_11 = arith.constant 0 : index
    %c3 = arith.constant 3 : index
    %c0_12 = arith.constant 0 : index
    %10 = vector.load %arg3[%c0_11, %c3, %c0_12] : memref<1x4x256xf32, #tpu.memory_space<vmem>>, vector<1x1x256xf32>
    %11 = vector.shape_cast %10 : vector<1x1x256xf32> to vector<1x256xf32>
    %c0_13 = arith.constant 0 : index
    %c0_14 = arith.constant 0 : index
    %c0_15 = arith.constant 0 : index
    %12 = vector.load %arg1[%c0_13, %c0_14, %c0_15] : memref<1x16x512xf32, #tpu.memory_space<vmem>>, vector<1x16x512xf32>
    %13 = vector.shape_cast %12 : vector<1x16x512xf32> to vector<16x512xf32>
    %14 = arith.truncf %13 : vector<16x512xf32> to vector<16x512xbf16>
    %cst = arith.constant dense<0.000000e+00> : vector<16x256xf32>
    %15 = tpu.matmul %14, %1, %cst {dimension_numbers = #tpu.dot_dimension_numbers<[1], [0], [0], [1], [0, 0, 1, 1], [], []>} : vector<16x512xbf16>, vector<512x256xbf16>, vector<16x256xf32> -> vector<16x256xf32>
    %16 = vector.broadcast %5 : vector<1x256xf32> to vector<16x256xf32>
    %17 = arith.addf %15, %16 : vector<16x256xf32>
    %cst_16 = arith.constant 5.000000e-01 : f32
    %18 = vector.broadcast %cst_16 : f32 to vector<16x256xf32>
    %19 = arith.mulf %18, %17 : vector<16x256xf32>
    %cst_17 = arith.constant 4.471500e-02 : f32
    %20 = vector.broadcast %cst_17 : f32 to vector<16x256xf32>
    %21 = arith.mulf %20, %17 : vector<16x256xf32>
    %22 = arith.mulf %21, %17 : vector<16x256xf32>
    %23 = arith.mulf %22, %17 : vector<16x256xf32>
    %24 = arith.addf %17, %23 : vector<16x256xf32>
    %cst_18 = arith.constant 0.797884583 : f32
    %25 = vector.broadcast %cst_18 : f32 to vector<16x256xf32>
    %26 = arith.mulf %25, %24 : vector<16x256xf32>
    %27 = math.tanh %26 : vector<16x256xf32>
    %cst_19 = arith.constant 1.000000e+00 : f32
    %28 = vector.broadcast %cst_19 : f32 to vector<16x256xf32>
    %29 = arith.addf %28, %27 : vector<16x256xf32>
    %30 = arith.mulf %19, %29 : vector<16x256xf32>
    %31 = arith.truncf %30 : vector<16x256xf32> to vector<16x256xbf16>
    %cst_20 = arith.constant dense<0.000000e+00> : vector<16x256xf32>
    %32 = tpu.matmul %31, %3, %cst_20 {dimension_numbers = #tpu.dot_dimension_numbers<[1], [0], [0], [1], [0, 0, 1, 1], [], []>} : vector<16x256xbf16>, vector<256x256xbf16>, vector<16x256xf32> -> vector<16x256xf32>
    %33 = vector.broadcast %7 : vector<1x256xf32> to vector<16x256xf32>
    %34 = arith.addf %32, %33 : vector<16x256xf32>
    %35 = arith.addf %34, %17 : vector<16x256xf32>
    %cst_21 = arith.constant dense<0.000000e+00> : vector<16xf32>
    %36 = vector.multi_reduction <add>, %35, %cst_21 [1] : vector<16x256xf32> to vector<16xf32>
    %37 = vector.shape_cast %36 : vector<16xf32> to vector<16x1xf32>
    %cst_22 = arith.constant 3.906250e-03 : f32
    %38 = vector.broadcast %cst_22 : f32 to vector<16x1xf32>
    %39 = arith.mulf %37, %38 : vector<16x1xf32>
    %40 = arith.mulf %35, %35 : vector<16x256xf32>
    %cst_23 = arith.constant dense<0.000000e+00> : vector<16xf32>
    %41 = vector.multi_reduction <add>, %40, %cst_23 [1] : vector<16x256xf32> to vector<16xf32>
    %42 = vector.shape_cast %41 : vector<16xf32> to vector<16x1xf32>
    %cst_24 = arith.constant 3.906250e-03 : f32
    %43 = vector.broadcast %cst_24 : f32 to vector<16x1xf32>
    %44 = arith.mulf %42, %43 : vector<16x1xf32>
    %45 = arith.mulf %39, %39 : vector<16x1xf32>
    %46 = arith.subf %44, %45 : vector<16x1xf32>
    %47 = vector.broadcast %39 : vector<16x1xf32> to vector<16x256xf32>
    %48 = arith.subf %35, %47 : vector<16x256xf32>
    %cst_25 = arith.constant 9.99999974E-6 : f32
    %49 = vector.broadcast %cst_25 : f32 to vector<16x1xf32>
    %50 = arith.addf %46, %49 : vector<16x1xf32>
    %51 = math.rsqrt %50 : vector<16x1xf32>
    %52 = vector.broadcast %51 : vector<16x1xf32> to vector<16x256xf32>
    %53 = arith.mulf %48, %52 : vector<16x256xf32>
    %54 = vector.broadcast %9 : vector<1x256xf32> to vector<16x256xf32>
    %55 = arith.mulf %53, %54 : vector<16x256xf32>
    %56 = vector.broadcast %11 : vector<1x256xf32> to vector<16x256xf32>
    %57 = arith.addf %55, %56 : vector<16x256xf32>
    %c0_i32 = arith.constant 0 : i32
    %58 = arith.cmpi eq, %arg0, %c0_i32 : i32
    %59 = arith.extui %58 : i1 to i32
    %c0_i32_26 = arith.constant 0 : i32
    %60 = arith.cmpi ne, %59, %c0_i32_26 : i32
    scf.if %60 {
      %c0_28 = arith.constant 0 : index
      %c0_29 = arith.constant 0 : index
      %64 = vector.load %arg5[%c0_28, %c0_29] : memref<16x256xf32, #tpu.memory_space<vmem>>, vector<16x256xf32>
      tpu.vector_store %arg5[%c0_28, %c0_29], %57 {strides = array<i32>} : memref<16x256xf32, #tpu.memory_space<vmem>>, vector<16x256xf32>,
    } else {
    }
    %c1_i32 = arith.constant 1 : i32
    %61 = arith.cmpi eq, %arg0, %c1_i32 : i32
    %62 = arith.extui %61 : i1 to i32
    %c0_i32_27 = arith.constant 0 : i32
    %63 = arith.cmpi ne, %62, %c0_i32_27 : i32
    scf.if %63 {
      %c0_28 = arith.constant 0 : index
      %c0_29 = arith.constant 0 : index
      %64 = vector.load %arg5[%c0_28, %c0_29] : memref<16x256xf32, #tpu.memory_space<vmem>>, vector<16x256xf32>
      %cst_30 = arith.constant dense<0.000000e+00> : vector<16x16xf32>
      %65 = tpu.matmul %57, %64, %cst_30 {dimension_numbers = #tpu.dot_dimension_numbers<[1], [1], [0], [0], [0, 0, 1, 0], [], []>} : vector<16x256xf32>, vector<16x256xf32>, vector<16x16xf32> -> vector<16x16xf32>
      %cst_31 = arith.constant 1.000000e+00 : f32
      %66 = vector.broadcast %cst_31 : f32 to vector<16x16xf32>
      %67 = arith.mulf %65, %66 : vector<16x16xf32>
      %cst_32 = arith.constant dense<0.000000e+00> : vector<16x16xf32>
      %68 = tpu.matmul %64, %57, %cst_32 {dimension_numbers = #tpu.dot_dimension_numbers<[1], [1], [0], [0], [0, 0, 1, 0], [], []>} : vector<16x256xf32>, vector<16x256xf32>, vector<16x16xf32> -> vector<16x16xf32>
      %cst_33 = arith.constant 1.000000e+00 : f32
      %69 = vector.broadcast %cst_33 : f32 to vector<16x16xf32>
      %70 = arith.mulf %68, %69 : vector<16x16xf32>
      %71 = tpu.concatenate %64, %57 in 1 : vector<16x256xf32>, vector<16x256xf32> -> vector<16x512xf32>
      %cst_34 = arith.constant dense<0.000000e+00> : vector<16x16xf32>
      %72 = tpu.matmul %71, %71, %cst_34 {dimension_numbers = #tpu.dot_dimension_numbers<[1], [1], [0], [0], [0, 0, 1, 0], [], []>} : vector<16x512xf32>, vector<16x512xf32>, vector<16x16xf32> -> vector<16x16xf32>
      %cst_35 = arith.constant 5.000000e-01 : f32
      %73 = vector.broadcast %cst_35 : f32 to vector<16x16xf32>
      %74 = arith.mulf %72, %73 : vector<16x16xf32>
      %cst_36 = arith.constant dense<0xFF800000> : vector<16xf32>
      %75 = vector.multi_reduction <maximumf>, %74, %cst_36 [1] : vector<16x16xf32> to vector<16xf32>
      %76 = vector.shape_cast %75 : vector<16xf32> to vector<16x1xf32>
      %77 = vector.broadcast %76 : vector<16x1xf32> to vector<16x16xf32>
      %78 = arith.subf %74, %77 : vector<16x16xf32>
      %79 = math.exp %78 : vector<16x16xf32>
      %cst_37 = arith.constant dense<0.000000e+00> : vector<16xf32>
      %80 = vector.multi_reduction <add>, %79, %cst_37 [1] : vector<16x16xf32> to vector<16xf32>
      %81 = vector.shape_cast %80 : vector<16xf32> to vector<16x1xf32>
      %82 = tpu.reciprocal %81 {approx = true} : vector<16x1xf32> -> vector<16x1xf32>
      %83 = vector.broadcast %82 : vector<16x1xf32> to vector<16x16xf32>
      %84 = arith.mulf %79, %83 : vector<16x16xf32>
      %cst_38 = arith.constant dense<0xFF800000> : vector<16xf32>
      %85 = vector.multi_reduction <maximumf>, %67, %cst_38 [1] : vector<16x16xf32> to vector<16xf32>
      %86 = vector.shape_cast %85 : vector<16xf32> to vector<16x1xf32>
      %87 = vector.broadcast %86 : vector<16x1xf32> to vector<16x16xf32>
      %88 = arith.subf %67, %87 : vector<16x16xf32>
      %89 = math.exp %88 : vector<16x16xf32>
      %cst_39 = arith.constant dense<0.000000e+00> : vector<16xf32>
      %90 = vector.multi_reduction <add>, %89, %cst_39 [1] : vector<16x16xf32> to vector<16xf32>
      %91 = vector.shape_cast %90 : vector<16xf32> to vector<16x1xf32>
      %92 = math.log %91 : vector<16x1xf32>
      %93 = arith.addf %86, %92 : vector<16x1xf32>
      %94 = vector.broadcast %93 : vector<16x1xf32> to vector<16x16xf32>
      %95 = arith.subf %67, %94 : vector<16x16xf32>
      %cst_40 = arith.constant dense<0xFF800000> : vector<16xf32>
      %96 = vector.multi_reduction <maximumf>, %70, %cst_40 [1] : vector<16x16xf32> to vector<16xf32>
      %97 = vector.shape_cast %96 : vector<16xf32> to vector<16x1xf32>
      %98 = vector.broadcast %97 : vector<16x1xf32> to vector<16x16xf32>
      %99 = arith.subf %70, %98 : vector<16x16xf32>
      %100 = math.exp %99 : vector<16x16xf32>
      %cst_41 = arith.constant dense<0.000000e+00> : vector<16xf32>
      %101 = vector.multi_reduction <add>, %100, %cst_41 [1] : vector<16x16xf32> to vector<16xf32>
      %102 = vector.shape_cast %101 : vector<16xf32> to vector<16x1xf32>
      %103 = math.log %102 : vector<16x1xf32>
      %104 = arith.addf %97, %103 : vector<16x1xf32>
      %cst_42 = arith.constant 0.000000e+00 : f32
      %105 = vector.broadcast %cst_42 : f32 to vector<16x16xf32>
      %106 = arith.subf %105, %84 : vector<16x16xf32>
      %107 = arith.addf %95, %67 : vector<16x16xf32>
      %108 = arith.mulf %106, %107 : vector<16x16xf32>
      %cst_43 = arith.constant dense<0.000000e+00> : vector<16xf32>
      %109 = vector.multi_reduction <add>, %108, %cst_43 [1] : vector<16x16xf32> to vector<16xf32>
      %110 = vector.shape_cast %109 : vector<16xf32> to vector<16x1xf32>
      %cst_44 = arith.constant dense<0.000000e+00> : vector<16x1xf32>
      %111 = tpu.matmul %84, %104, %cst_44 {dimension_numbers = #tpu.dot_dimension_numbers<[1], [0], [0], [1], [0, 0, 1, 1], [], []>} : vector<16x16xf32>, vector<16x1xf32>, vector<16x1xf32> -> vector<16x1xf32>
      %112 = arith.addf %110, %111 : vector<16x1xf32>
      %cst_45 = arith.constant dense<0.000000e+00> : vector<1xf32>
      %113 = vector.multi_reduction <add>, %112, %cst_45 [0] : vector<16x1xf32> to vector<1xf32>
      %114 = vector.shape_cast %113 : vector<1xf32> to vector<1x1xf32>
      %115 = vector.extract %114[0, 0] : f32 from vector<1x1xf32>
      %cst_46 = arith.constant 3.125000e-02 : f32
      %116 = arith.mulf %115, %cst_46 : f32
      %c0_47 = arith.constant 0 : index
      %c0_48 = arith.constant 0 : index
      %117 = memref.load %arg4[%c0_47, %c0_48] : memref<1x1xf32, #tpu.memory_space<smem>>
      memref.store %116, %arg4[%c0_47, %c0_48] : memref<1x1xf32, #tpu.memory_space<smem>>
    } else {
    }
    return
  }
  func.func @transform_0(%arg0: i32) -> (i32, i32, i32) {
    %c0_i32 = arith.constant 0 : i32
    %c0_i32_0 = arith.constant 0 : i32
    %c0_i32_1 = arith.constant 0 : i32
    return %arg0, %c0_i32, %c0_i32_0 : i32, i32, i32
  }
  func.func @transform_1(%arg0: i32) -> (i32, i32, i32) {
    %c0_i32 = arith.constant 0 : i32
    %c0_i32_0 = arith.constant 0 : i32
    %c0_i32_1 = arith.constant 0 : i32
    return %arg0, %c0_i32, %c0_i32_0 : i32, i32, i32
  }
  func.func @transform_2(%arg0: i32) -> (i32, i32, i32) {
    %c0_i32 = arith.constant 0 : i32
    %c0_i32_0 = arith.constant 0 : i32
    %c0_i32_1 = arith.constant 0 : i32
    return %arg0, %c0_i32, %c0_i32_0 : i32, i32, i32
  }
  func.func @transform_3(%arg0: i32) -> (i32, i32) {
    %c0_i32 = arith.constant 0 : i32
    %c0_i32_0 = arith.constant 0 : i32
    %c0_i32_1 = arith.constant 0 : i32
    return %c0_i32, %c0_i32_0 : i32, i32
  }
}

</mosaic_0001>

<bundles_post_ra>
// kernel: tpu_custom_call.1
= control target key start
LH: loop header
LB: loop body
LE: loop exit
PB: predicated region body
PF: predicated region fallthrough
CT: control target
= control target key end

     0   :  { %8 = vsyncpa [#allocation4], 0  ;;  %s2786_s0 = inlined_call_operand.hbm [shape: f32[2,16,512], index: 0, kind: input, shape index: {}]   ;;  %s2787_s1 = inlined_call_operand.hbm [shape: bf16[2,768,256], index: 1, kind: input, shape index: {}]   ;;  %s2788_s2 = inlined_call_operand.hbm [shape: f32[2,4,256], index: 2, kind: input, shape index: {}]   ;;  %s2789_s3 = inlined_call_operand.hbm [shape: f32[1,1], index: 3, kind: output, shape index: {}]  }
   0x1   :  { %10 = vsyncpa [#allocation4 + $0x1], 0 }
   0x2   :  { %11 = vsyncpa [#allocation7], 0 }
   0x3   :  { %13 = vsyncpa [#allocation7 + $0x1], 0 }
   0x4   :  { %14 = vsyncpa [#allocation5], 0  ;;  %s2360_s12 = smov 0   ;;  %s2362_s13 = smov 0  }
   0x5   :  { %s2364_s14 = smov 0   ;;  %s2366_s15 = smov 0  }
   0x6 LB: > { %s2379_s16 = sadd.s32 4294967295, %s2333_s15   ;;  %s2382_s17 = sadd.s32 1, %s2333_s15   ;;  %s2333_s15 = sphi %s2366_s15, %s2796_s15   ;;  %s2329_s14 = sphi %s2364_s14, %s2795_s14   ;;  %s2325_s13 = sphi %s2362_s13, %s2794_s13   ;;  %s2321_s12 = sphi %s2360_s12, %s2793_s12  }
   0x7   : > { %s24_s18 = ssub.s32 %s2333_s15, %s2382_s17  ;;  %s27_s19 = sadd.s32 1, %s2329_s14 }
   0x8   : > { %p25_p0 = scmp.eq.s32.totalorder %s24_s18, 0  ;;  %p34_p1 = scmp.ne.s32.totalorder %s2329_s14, %s2325_s13 }
   0x9   : > { %p35_p2 = scmp.eq.s32.totalorder %s2333_s15, 0  ;;  %p40_p3 = scmp.ne.s32.totalorder %s2325_s13, %s2321_s12 }
   0xa   : > { %s2392_s20 = scalar_select %p25_p0, %s2329_s14, %s27_s19  }
   0xb   : > { %p36_p4 = por %p35_p2, %p34_p1  ;;  %p41_p5 = scmp.eq.s32.totalorder %s2379_s16, 0 }
   0xc   : > { %p2111_p6 = scmp.lt.s32.totalorder %s2333_s15, 2  ;;  %s2401_s22 = sand.u32 1, %s2329_s14  }
   0xd   : > { %p2396_p7 = por %p41_p5, %p40_p3  ;;  %s159_s24 = sand.u32 1, %s2333_s15  }
   0xe   : > { %p2403_p8 = pnand %p2111_p6, %p36_p4  ;;  %s2086_s25 = smul.u32 768, %s2401_s22 }
   0xf   : > { %s2087_s26 = smul.u32 768, %s2333_s15  ;;  %s2413_s6 = scalar_lea.sflag [#allocation7], %s159_s24 }
  0x10   : > { %s163_s30 = scalar_lea.vmem [#allocation6], %s2086_s25  ;;  %p2191_p10 = pneg %p2403_p8 }
  0x11   : > { %s168_s29 = scalar_lea.hbm %s2787_s1, %s2087_s26  ;;  %s171_s4 = sshll.u32 %s163_s30, 4  ;;  %s172_s4 = int_to_ptr.vmem [resolvable:$true] %s171_s4 }
  0x12   : > { %s169_s5 = sshll.u32 %s168_s29, 4  ;;  %s2194_s11 = scalar_lea.hbm %s2787_s1, 1536  ;;  %s170_s5 = int_to_ptr.hbm [resolvable:$true] %s169_s5 }
  0x13   : > { %s2187_s7 = sshra.s32 %s170_s5, 4  ;;  %s2188_s7 = int_to_ptr.hbm [resolvable:$true] %s2187_s7 }
  0x14   : > { %s2189_s8 = scalar_lea.hbm %s2188_s7, 768  ;;  %p2195_p13 = scmp.lt.s32.totalorder %s2188_s7, %s2787_s1 }
  0x15   : > { %p2190_p9 = scmp.ne.s32.totalorder %s2188_s7, %s2189_s8  ;;  %p2196_p0 = scmp.lt.s32.totalorder %s2194_s11, %s2189_s8 }
  0x17   : > { %p2192_p11 = pnand %p2191_p10, %p2190_p9  ;;  %p2197_p1 = por %p2196_p0, %p2195_p13 }
  0x19   : > { %p2193_p12 = pneg %p2192_p11 }
  0x1b   : > { %p2198_p2 = pnand %p2197_p1, %p2193_p12 }
  0x1d   : > { %2201 = shalt.err (!%p2198_p2)
}
  0x1e   : > { %s2335_s19 = smov 128   ;;  %s2336_s24 = smov 8  }
  0x1f   : > { %2107 = dma.hbm_to_vmem [thread:$0]  (!%p2403_p8), %s170_s5, 12288, %s172_s4, %s2413_s6, %s2335_s19, %s2335_s19, %s2336_s24  }
  0x20   : > { %p1588_p3 = scmp.ge.s32.totalorder %s2333_s15, 1  ;;  %p199_p4 = scmp.lt.s32.totalorder %s2333_s15, 3 }
  0x21   : > { %s1581_s25 = sshll.u32 %s2401_s22, 6  ;;  %s1986_s27 = sshll.u32 %s2333_s15, 6 }
  0x22   : > { %p2432_p5 = pnand %p1588_p3, %p199_p4  ;;  %s141_s28 = scalar_lea.vmem [#allocation3], %s1581_s25 }
  0x23   : > { %s149_s29 = sshll.u32 %s141_s28, 4  ;;  %s146_s8 = scalar_lea.hbm %s2786_s0, %s1986_s27  ;;  %s150_s29 = int_to_ptr.vmem [resolvable:$true] %s149_s29 }
  0x24   : > { %s147_s9 = sshll.u32 %s146_s8, 4  ;;  %s138_s10 = scalar_lea.sflag [#allocation4], %s2401_s22  ;;  %s148_s9 = int_to_ptr.hbm [resolvable:$true] %s147_s9 }
  0x25   : > { %s2217_s4 = sshra.s32 %s148_s9, 4  ;;  %s2224_s18 = scalar_lea.hbm %s2786_s0, 128  ;;  %s2218_s4 = int_to_ptr.hbm [resolvable:$true] %s2217_s4 }
  0x26   : > { %s2219_s5 = scalar_lea.hbm %s2218_s4, 64  ;;  %p2225_p12 = scmp.lt.s32.totalorder %s2218_s4, %s2786_s0 }
  0x27   : > { %p2220_p6 = scmp.ne.s32.totalorder %s2218_s4, %s2219_s5  ;;  %p2226_p13 = scmp.lt.s32.totalorder %s2224_s18, %s2219_s5 }
  0x29   : > { %p2222_p9 = pnand %p2220_p6, %p2191_p10  ;;  %p2227_p0 = por %p2226_p13, %p2225_p12 }
  0x2b   : > { %p2223_p11 = pneg %p2222_p9 }
  0x2d   : > { %p2228_p1 = pnand %p2227_p0, %p2223_p11 }
  0x2f   : > { %2231 = shalt.err (!%p2228_p1)
}
  0x30   : > { %s2337_s25 = smov 512   ;;  %s2338_s27 = smov 32  }
  0x31   : > { %2104 = dma.hbm_to_vmem [thread:$0]  (!%p2403_p8), %s148_s9, 1024, %s150_s29, %s138_s10, %s2337_s25, %s2337_s25, %s2338_s27  }
  0x32   : > { %s1585_s28 = sshll.u32 %s2401_s22, 3  ;;  %s1987_s30 = sshll.u32 %s2333_s15, 3 }
  0x33   : > { %s190_s11 = scalar_lea.hbm %s2788_s2, %s1987_s30  ;;  %s185_s4 = scalar_lea.vmem [#allocation8], %s1585_s28 }
  0x34   : > { %s192_s12 = sshll.u32 %s190_s11, 4  ;;  %s194_s5 = sshll.u32 %s185_s4, 4  ;;  %s193_s12 = int_to_ptr.hbm [resolvable:$true] %s192_s12  ;;  %s195_s5 = int_to_ptr.vmem [resolvable:$true] %s194_s5 }
  0x35   : > { %s2247_s18 = sshra.s32 %s193_s12, 4  ;;  %s2254_s15 = scalar_lea.hbm %s2788_s2, 16  ;;  %s2248_s18 = int_to_ptr.hbm [resolvable:$true] %s2247_s18 }
  0x36   : > { %s2249_s19 = scalar_lea.hbm %s2248_s18, 8  ;;  %p2255_p6 = scmp.lt.s32.totalorder %s2248_s18, %s2788_s2 }
  0x37   : > { %p2250_p2 = scmp.ne.s32.totalorder %s2248_s18, %s2249_s19  ;;  %p2256_p9 = scmp.lt.s32.totalorder %s2254_s15, %s2249_s19 }
  0x39   : > { %p2252_p3 = pnand %p2250_p2, %p2191_p10  ;;  %p2257_p11 = por %p2256_p9, %p2255_p6 }
  0x3b   : > { %p2253_p4 = pneg %p2252_p3 }
  0x3d   : > { %p2258_p12 = pnand %p2257_p11, %p2253_p4 }
  0x3f   : > { %2261 = shalt.err (!%p2258_p12)
}
  0x40   : > { %2110 = dma.hbm_to_vmem [thread:$0]  (!%p2403_p8), %s193_s12, 128, %s195_s5, %s2413_s6  }
  0x41   : > { %203 = sbr.rel (%p2432_p5) target bundleno = 1371 (0x55b), region = 32  ;;  %s2472_s24 = sand.u32 (!%p2432_p5), 1, %s2325_s13  }
  0x42   : > { %s1589_s25 = sshll.u32 (!%p2432_p5), %s2472_s24, 6  ;;  %s206_s27 = scalar_lea.sflag (!%p2432_p5), [#allocation4], %s2472_s24 }
  0x43   : > { %s2476_s28 = scalar_lea.vmem (!%p2432_p5), [#allocation3], %s1589_s25 }
  0x46   : > { %2308 = dma.done.wait (%p2396_p7), %s206_s27, 1024  }
  0x47   : > { %2310 = vsyncadd (%p2396_p7), %s206_s27, 4294966272  ;;  %s215_s23 = sand.u32 1, %s2379_s16   ;;  %s2088_s6 = smul.u32 768, %s2472_s24 }
  0x48   : > { %s216_s26 = scalar_lea.sflag [#allocation7], %s215_s23 }
  0x49   : > { %s2484_s30 = scalar_lea.vmem [#allocation6], %s2088_s6 }
  0x4a   : > { %2312 = dma.done.wait (%p2396_p7), %s216_s26, 12416  }
  0x4b   : > { %2314 = vsyncadd (%p2396_p7), %s216_s26, 4294954880  ;;  %v1652_v0 = vld [vmem:[%s2484_s30 + $0x70] sm:$0xf]  ;;  %v2003_v1 = vld [vmem:[%s2484_s30 + $0x74] sm:$0xf0]  ;;  %s1590_s21 = sshll.u32 %s2472_s24, 3 }
  0x4c   : > { %v1716_v2 = vld [vmem:[%s2484_s30 + $0xf0] sm:$0xf]  ;;  %v1653_v3 = vor.u32 %v2003_v1, %v1652_v0  ;;  %v2019_v4 = vld [vmem:[%s2484_s30 + $0xf4] sm:$0xf0]  ;;  %v1644_v11 = vld [vmem:[%s2484_s30 + $0x60] sm:$0xf] }
  0x4d   : > { %v1780_v5 = vld [vmem:[%s2484_s30 + $0x170] sm:$0xf]  ;;  %v2035_v6 = vld [vmem:[%s2484_s30 + $0x174] sm:$0xf0]  ;;  %v1717_v7 = vor.u32 %v2019_v4, %v1716_v2  ;;  %v2001_v13 = vld [vmem:[%s2484_s30 + $0x64] sm:$0xf0] }
  0x4e   : > { %v1781_v8 = vor.u32 %v2035_v6, %v1780_v5  ;;  %v1844_v9 = vld [vmem:[%s2484_s30 + $0x1f0] sm:$0xf]  ;;  %v2051_v10 = vld [vmem:[%s2484_s30 + $0x1f4] sm:$0xf0]  ;;  %698 = vmatpush.bf16.msra.mxu0 %v1653_v3  ;;  %v1708_v14 = vld [vmem:[%s2484_s30 + $0xe0] sm:$0xf]  ;;  %v1645_v16 = vor.u32 %v2001_v13, %v1644_v11 }
  0x4f   : > { %v1845_v12 = vor.u32 %v2051_v10, %v1844_v9  ;;  %v2017_v15 = vld [vmem:[%s2484_s30 + $0xe4] sm:$0xf0]  ;;  %712 = vmatpush.bf16.msra.mxu1 %v1717_v7  ;;  %v1772_v18 = vld [vmem:[%s2484_s30 + $0x160] sm:$0xf]  ;;  %v1636_v23 = vld [vmem:[%s2484_s30 + $0x50] sm:$0xf] }
  0x50   : > { %726 = vmatpush.bf16.msra.mxu2 %v1781_v8  ;;  %v1709_v17 = vor.u32 %v2017_v15, %v1708_v14  ;;  %v2033_v19 = vld [vmem:[%s2484_s30 + $0x164] sm:$0xf0]  ;;  %v1836_v20 = vld [vmem:[%s2484_s30 + $0x1e0] sm:$0xf]  ;;  %v1999_v24 = vld [vmem:[%s2484_s30 + $0x54] sm:$0xf0] }
  0x51   : > { %740 = vmatpush.bf16.msra.mxu3 %v1845_v12  ;;  %v1773_v21 = vor.u32 %v2033_v19, %v1772_v18  ;;  %v2049_v22 = vld [vmem:[%s2484_s30 + $0x1e4] sm:$0xf0]  ;;  %v1700_v26 = vld [vmem:[%s2484_s30 + $0xd0] sm:$0xf]  ;;  %v2015_v27 = vld [vmem:[%s2484_s30 + $0xd4] sm:$0xf0]  ;;  %v1637_v29 = vor.u32 %v1999_v24, %v1636_v23 }
  0x52   : > { %v1837_v25 = vor.u32 %v2049_v22, %v1836_v20  ;;  %v1764_v28 = vld [vmem:[%s2484_s30 + $0x150] sm:$0xf]  ;;  %699 = vmatpush.bf16.msra.mxu0 %v1645_v16  ;;  %v2031_v30 = vld [vmem:[%s2484_s30 + $0x154] sm:$0xf0]  ;;  %v1701_v33 = vor.u32 %v2015_v27, %v1700_v26  ;;  %v1628_v35 = vld [vmem:[%s2484_s30 + $0x40] sm:$0xf] }
  0x53   : > { %v1828_v31 = vld [vmem:[%s2484_s30 + $0x1d0] sm:$0xf]  ;;  %v2047_v32 = vld [vmem:[%s2484_s30 + $0x1d4] sm:$0xf0]  ;;  %713 = vmatpush.bf16.msra.mxu1 %v1709_v17  ;;  %v1765_v34 = vor.u32 %v2031_v30, %v1764_v28  ;;  %v1997_v36 = vld [vmem:[%s2484_s30 + $0x44] sm:$0xf0] }
  0x54   : > { %727 = vmatpush.bf16.msra.mxu2 %v1773_v21  ;;  %v1692_v37 = vld [vmem:[%s2484_s30 + $0xc0] sm:$0xf]  ;;  %v1829_v38 = vor.u32 %v2047_v32, %v1828_v31  ;;  %v2013_v39 = vld [vmem:[%s2484_s30 + $0xc4] sm:$0xf0]  ;;  %v1629_v44 = vor.u32 %v1997_v36, %v1628_v35  ;;  %v1620_v47 = vld [vmem:[%s2484_s30 + $0x30] sm:$0xf] }
  0x55   : > { %741 = vmatpush.bf16.msra.mxu3 %v1837_v25  ;;  %v1756_v40 = vld [vmem:[%s2484_s30 + $0x140] sm:$0xf]  ;;  %v2029_v41 = vld [vmem:[%s2484_s30 + $0x144] sm:$0xf0]  ;;  %v1693_v45 = vor.u32 %v2013_v39, %v1692_v37  ;;  %v1995_v48 = vld [vmem:[%s2484_s30 + $0x34] sm:$0xf0] }
  0x56   : > { %v1820_v42 = vld [vmem:[%s2484_s30 + $0x1c0] sm:$0xf]  ;;  %v2045_v43 = vld [vmem:[%s2484_s30 + $0x1c4] sm:$0xf0]  ;;  %700 = vmatpush.bf16.msra.mxu0 %v1637_v29  ;;  %v1757_v46 = vor.u32 %v2029_v41, %v1756_v40  ;;  %v1684_v49 = vld [vmem:[%s2484_s30 + $0xb0] sm:$0xf]  ;;  %v1621_v56 = vor.u32 %v1995_v48, %v1620_v47 }
  0x57   : > { %714 = vmatpush.bf16.msra.mxu1 %v1701_v33  ;;  %v1821_v50 = vor.u32 %v2045_v43, %v1820_v42  ;;  %v2011_v51 = vld [vmem:[%s2484_s30 + $0xb4] sm:$0xf0]  ;;  %v1748_v52 = vld [vmem:[%s2484_s30 + $0x130] sm:$0xf]  ;;  %v1612_v59 = vld [vmem:[%s2484_s30 + $0x20] sm:$0xf] }
  0x58   : > { %728 = vmatpush.bf16.msra.mxu2 %v1765_v34  ;;  %v2027_v53 = vld [vmem:[%s2484_s30 + $0x134] sm:$0xf0]  ;;  %v1812_v54 = vld [vmem:[%s2484_s30 + $0x1b0] sm:$0xf]  ;;  %v1685_v57 = vor.u32 %v2011_v51, %v1684_v49  ;;  %v1993_v60 = vld [vmem:[%s2484_s30 + $0x24] sm:$0xf0] }
  0x59   : > { %742 = vmatpush.bf16.msra.mxu3 %v1829_v38  ;;  %v2043_v55 = vld [vmem:[%s2484_s30 + $0x1b4] sm:$0xf0]  ;;  %v1749_v58 = vor.u32 %v2027_v53, %v1748_v52  ;;  %v1676_v61 = vld [vmem:[%s2484_s30 + $0xa0] sm:$0xf]  ;;  %v2009_v63 = vld [vmem:[%s2484_s30 + $0xa4] sm:$0xf0]  ;;  %v1613_v4 = vor.u32 %v1993_v60, %v1612_v59 }
  0x5a   : > { %701 = vmatpush.bf16.msra.mxu0 %v1629_v44  ;;  %v1813_v62 = vor.u32 %v2043_v55, %v1812_v54  ;;  %v1740_v0 = vld [vmem:[%s2484_s30 + $0x120] sm:$0xf]  ;;  %v2025_v1 = vld [vmem:[%s2484_s30 + $0x124] sm:$0xf0]  ;;  %v1604_v5 = vld [vmem:[%s2484_s30 + $0x10] sm:$0xf]  ;;  %v1677_v6 = vor.u32 %v2009_v63, %v1676_v61 }
  0x5b   : > { %715 = vmatpush.bf16.msra.mxu1 %v1693_v45  ;;  %v1804_v2 = vld [vmem:[%s2484_s30 + $0x1a0] sm:$0xf]  ;;  %v2041_v3 = vld [vmem:[%s2484_s30 + $0x1a4] sm:$0xf0]  ;;  %v1741_v7 = vor.u32 %v2025_v1, %v1740_v0  ;;  %v1991_v8 = vld [vmem:[%s2484_s30 + $0x14] sm:$0xf0] }
  0x5c   : > { %729 = vmatpush.bf16.msra.mxu2 %v1757_v46  ;;  %v1668_v9 = vld [vmem:[%s2484_s30 + $0x90] sm:$0xf]  ;;  %v2007_v10 = vld [vmem:[%s2484_s30 + $0x94] sm:$0xf0]  ;;  %v1805_v11 = vor.u32 %v2041_v3, %v1804_v2  ;;  %v1596_v16 = vld [vmem:[%s2484_s30] sm:$0xf]  ;;  %v1605_v18 = vor.u32 %v1991_v8, %v1604_v5 }
  0x5d   : > { %743 = vmatpush.bf16.msra.mxu3 %v1821_v50  ;;  %v1732_v12 = vld [vmem:[%s2484_s30 + $0x110] sm:$0xf]  ;;  %v2023_v13 = vld [vmem:[%s2484_s30 + $0x114] sm:$0xf0]  ;;  %v1989_v17 = vld [vmem:[%s2484_s30 + $0x4] sm:$0xf0]  ;;  %v1669_v23 = vor.u32 %v2007_v10, %v1668_v9 }
  0x5e   : > { %702 = vmatpush.bf16.msra.mxu0 %v1621_v56  ;;  %v1796_v14 = vld [vmem:[%s2484_s30 + $0x190] sm:$0xf]  ;;  %v2039_v15 = vld [vmem:[%s2484_s30 + $0x194] sm:$0xf0]  ;;  %v1660_v19 = vld [vmem:[%s2484_s30 + $0x80] sm:$0xf]  ;;  %v1733_v24 = vor.u32 %v2023_v13, %v1732_v12  ;;  %v1597_v35 = vor.u32 %v1989_v17, %v1596_v16 }
  0x5f   : > { %716 = vmatpush.bf16.msra.mxu1 %v1685_v57  ;;  %v2005_v20 = vld [vmem:[%s2484_s30 + $0x84] sm:$0xf0]  ;;  %v1724_v21 = vld [vmem:[%s2484_s30 + $0x100] sm:$0xf]  ;;  %v2002_v27 = vld [vmem:[%s2484_s30 + $0x74] sm:$0xf]  ;;  %v1797_v28 = vor.u32 %v2039_v15, %v1796_v14 }
  0x60   : > { %730 = vmatpush.bf16.msra.mxu2 %v1749_v58  ;;  %v2021_v22 = vld [vmem:[%s2484_s30 + $0x104] sm:$0xf0]  ;;  %v1788_v25 = vld [vmem:[%s2484_s30 + $0x180] sm:$0xf]  ;;  %v1654_v29 = vld [vmem:[%s2484_s30 + $0x78] sm:$0xf0]  ;;  %v1661_v39 = vor.u32 %v2005_v20, %v1660_v19 }
  0x61   : > { %744 = vmatpush.bf16.msra.mxu3 %v1813_v62  ;;  %v2037_v26 = vld [vmem:[%s2484_s30 + $0x184] sm:$0xf0]  ;;  %v2018_v30 = vld [vmem:[%s2484_s30 + $0xf4] sm:$0xf]  ;;  %v1718_v31 = vld [vmem:[%s2484_s30 + $0xf8] sm:$0xf0]  ;;  %v1725_v40 = vor.u32 %v2021_v22, %v1724_v21  ;;  %v1657_v45 = vor.u32 %v2002_v27, %v1654_v29 }
  0x62   : > { %703 = vmatpush.bf16.msra.mxu0 %v1613_v4  ;;  %v2034_v32 = vld [vmem:[%s2484_s30 + $0x174] sm:$0xf]  ;;  %v1782_v33 = vld [vmem:[%s2484_s30 + $0x178] sm:$0xf0]  ;;  %v361_v41 = vld [vmem:[%s2476_s28] sm:$0xff]  ;;  %v1789_v44 = vor.u32 %v2037_v26, %v1788_v25  ;;  %v1721_v49 = vor.u32 %v2018_v30, %v1718_v31  ;;  %s2663_s7 = scalar_lea.vmem [#allocation8], %s1590_s21 }
  0x63   : > { %717 = vmatpush.bf16.msra.mxu1 %v1677_v6  ;;  %v2050_v34 = vld [vmem:[%s2484_s30 + $0x1f4] sm:$0xf]  ;;  %v1846_v36 = vld [vmem:[%s2484_s30 + $0x1f8] sm:$0xf0]  ;;  %v365_v42 = vld [vmem:[%s2476_s28 + $0x20] sm:$0xff]  ;;  %v1785_v50 = vor.u32 %v2034_v32, %v1782_v33  ;;  %p1978_p7 = scmp.ne.s32.totalorder %s2379_s16, 0 }
  0x64   : > { %731 = vmatpush.bf16.msra.mxu2 %v1741_v7  ;;  %v363_v37 = vld [vmem:[%s2476_s28 + $0x10] sm:$0xff]  ;;  %v364_v43 = vld [vmem:[%s2476_s28 + $0x18] sm:$0xff]  ;;  %v2000_v47 = vld [vmem:[%s2484_s30 + $0x64] sm:$0xf]  ;;  %v1849_v54 = vor.u32 %v2050_v34, %v1846_v36  ;;  %v2578_v59 = vpack.c.bf16 %v365_v42, %v361_v41 }
  0x65   : > { %745 = vmatpush.bf16.msra.mxu3 %v1805_v11  ;;  %v367_v38 = vld [vmem:[%s2476_s28 + $0x30] sm:$0xff]  ;;  %v368_v46 = vld [vmem:[%s2476_s28 + $0x38] sm:$0xff]  ;;  %v1646_v48 = vld [vmem:[%s2484_s30 + $0x68] sm:$0xf0] }
  0x66   : > { %704 = vmatpush.bf16.msra.mxu0 %v1605_v18  ;;  %v2016_v51 = vld [vmem:[%s2484_s30 + $0xe4] sm:$0xf]  ;;  %v362_v52 = vld [vmem:[%s2476_s28 + $0x8] sm:$0xff]  ;;  %v2573_v55 = vpack.c.bf16 %v367_v38, %v363_v37  ;;  %v2580_v60 = vpack.c.bf16 %v368_v46, %v364_v43  ;;  %v1649_v63 = vor.u32 %v2000_v47, %v1646_v48  ;;  %v1998_v3 = vld [vmem:[%s2484_s30 + $0x54] sm:$0xf] }
  0x67   : > { %718 = vmatpush.bf16.msra.mxu1 %v1669_v23  ;;  %v366_v53 = vld [vmem:[%s2476_s28 + $0x28] sm:$0xff]  ;;  %v2032_v57 = vld [vmem:[%s2484_s30 + $0x164] sm:$0xf]  ;;  %v1638_v4 = vld [vmem:[%s2484_s30 + $0x58] sm:$0xf0] }
  0x68   : > { %732 = vmatpush.bf16.msra.mxu2 %v1733_v24  ;;  %v1710_v56 = vld [vmem:[%s2484_s30 + $0xe8] sm:$0xf0]  ;;  %v2048_v61 = vld [vmem:[%s2484_s30 + $0x1e4] sm:$0xf]  ;;  %v2584_v0 = vpack.c.bf16 %v366_v53, %v362_v52  ;;  %v2014_v5 = vld [vmem:[%s2484_s30 + $0xd4] sm:$0xf]  ;;  %v1641_v12 = vor.u32 %v1998_v3, %v1638_v4 }
  0x69   : > { %746 = vmatpush.bf16.msra.mxu3 %v1797_v28  ;;  %v1774_v58 = vld [vmem:[%s2484_s30 + $0x168] sm:$0xf0]  ;;  %v1713_v1 = vor.u32 %v2016_v51, %v1710_v56  ;;  %v1702_v7 = vld [vmem:[%s2484_s30 + $0xd8] sm:$0xf0]  ;;  %v2030_v8 = vld [vmem:[%s2484_s30 + $0x154] sm:$0xf] }
  0x6a   : > { %705 = vmatpush.bf16.msra.mxu0 %v1597_v35  ;;  %v1838_v62 = vld [vmem:[%s2484_s30 + $0x1e8] sm:$0xf0]  ;;  %v1777_v2 = vor.u32 %v2032_v57, %v1774_v58  ;;  %v1766_v9 = vld [vmem:[%s2484_s30 + $0x158] sm:$0xf0]  ;;  %v2046_v10 = vld [vmem:[%s2484_s30 + $0x1d4] sm:$0xf]  ;;  %v1705_v13 = vor.u32 %v2014_v5, %v1702_v7 }
  0x6b   : > { %719 = vmatpush.bf16.msra.mxu1 %v1661_v39  ;;  %v1841_v6 = vor.u32 %v2048_v61, %v1838_v62  ;;  %v1830_v11 = vld [vmem:[%s2484_s30 + $0x1d8] sm:$0xf0]  ;;  %v1769_v14 = vor.u32 %v2030_v8, %v1766_v9  ;;  %v1996_v15 = vld [vmem:[%s2484_s30 + $0x44] sm:$0xf]  ;;  %v1630_v16 = vld [vmem:[%s2484_s30 + $0x48] sm:$0xf0] }
  0x6c   : > { %733 = vmatpush.bf16.msra.mxu2 %v1725_v40  ;;  %v2012_v17 = vld [vmem:[%s2484_s30 + $0xc4] sm:$0xf]  ;;  %v1833_v18 = vor.u32 %v2046_v10, %v1830_v11  ;;  %v1694_v19 = vld [vmem:[%s2484_s30 + $0xc8] sm:$0xf0]  ;;  %v1633_v24 = vor.u32 %v1996_v15, %v1630_v16  ;;  %v1994_v27 = vld [vmem:[%s2484_s30 + $0x34] sm:$0xf] }
  0x6d   : > { %747 = vmatpush.bf16.msra.mxu3 %v1789_v44  ;;  %706 = vmatmul.bf16.vlgmr.msra.gmra.mxu0 %v2578_v59  ;;  %v2028_v20 = vld [vmem:[%s2484_s30 + $0x144] sm:$0xf]  ;;  %v1758_v21 = vld [vmem:[%s2484_s30 + $0x148] sm:$0xf0]  ;;  %v1697_v25 = vor.u32 %v2012_v17, %v1694_v19  ;;  %v1622_v28 = vld [vmem:[%s2484_s30 + $0x38] sm:$0xf0] }
  0x6e   : > { %754 = vmatpush.bf16.msrb.mxu0 %v1657_v45  ;;  %720 = vmatmul.bf16.vlgmr.msra.gmra.mxu1 %v2584_v0  ;;  %v2044_v22 = vld [vmem:[%s2484_s30 + $0x1c4] sm:$0xf]  ;;  %v1822_v23 = vld [vmem:[%s2484_s30 + $0x1c8] sm:$0xf0]  ;;  %v1761_v26 = vor.u32 %v2028_v20, %v1758_v21  ;;  %v2010_v29 = vld [vmem:[%s2484_s30 + $0xb4] sm:$0xf]  ;;  %v1625_v36 = vor.u32 %v1994_v27, %v1622_v28 }
  0x6f   : > { %768 = vmatpush.bf16.msrb.mxu1 %v1721_v49  ;;  %734 = vmatmul.bf16.vlgmr.msra.gmra.mxu2 %v2573_v55  ;;  %v1825_v30 = vor.u32 %v2044_v22, %v1822_v23  ;;  %v1686_v31 = vld [vmem:[%s2484_s30 + $0xb8] sm:$0xf0]  ;;  %v2026_v32 = vld [vmem:[%s2484_s30 + $0x134] sm:$0xf]  ;;  %v1992_v39 = vld [vmem:[%s2484_s30 + $0x24] sm:$0xf] }
  0x70   : > { %782 = vmatpush.bf16.msrb.mxu2 %v1785_v50  ;;  %748 = vmatmul.bf16.vlgmr.msra.gmra.mxu3 %v2580_v60  ;;  %v1750_v33 = vld [vmem:[%s2484_s30 + $0x138] sm:$0xf0]  ;;  %v2042_v34 = vld [vmem:[%s2484_s30 + $0x1b4] sm:$0xf]  ;;  %v1689_v37 = vor.u32 %v2010_v29, %v1686_v31  ;;  %v1614_v40 = vld [vmem:[%s2484_s30 + $0x28] sm:$0xf0] }
  0x71   : > { %796 = vmatpush.bf16.msrb.mxu3 %v1849_v54  ;;  %v1814_v35 = vld [vmem:[%s2484_s30 + $0x1b8] sm:$0xf0]  ;;  %v1753_v38 = vor.u32 %v2026_v32, %v1750_v33  ;;  %v2008_v41 = vld [vmem:[%s2484_s30 + $0xa4] sm:$0xf]  ;;  %v1678_v43 = vld [vmem:[%s2484_s30 + $0xa8] sm:$0xf0]  ;;  %v1617_v48 = vor.u32 %v1992_v39, %v1614_v40 }
  0x72   : > { %755 = vmatpush.bf16.msrb.mxu0 %v1649_v63  ;;  %v1817_v42 = vor.u32 %v2042_v34, %v1814_v35  ;;  %v2024_v44 = vld [vmem:[%s2484_s30 + $0x124] sm:$0xf]  ;;  %v1742_v45 = vld [vmem:[%s2484_s30 + $0x128] sm:$0xf0]  ;;  %v1681_v49 = vor.u32 %v2008_v41, %v1678_v43  ;;  %v1990_v51 = vld [vmem:[%s2484_s30 + $0x14] sm:$0xf] }
  0x73   : > { %769 = vmatpush.bf16.msrb.mxu1 %v1713_v1  ;;  %v2040_v46 = vld [vmem:[%s2484_s30 + $0x1a4] sm:$0xf]  ;;  %v1806_v47 = vld [vmem:[%s2484_s30 + $0x1a8] sm:$0xf0]  ;;  %v1745_v50 = vor.u32 %v2024_v44, %v1742_v45  ;;  %v1606_v52 = vld [vmem:[%s2484_s30 + $0x18] sm:$0xf0] }
  0x74   : > { %783 = vmatpush.bf16.msrb.mxu2 %v1777_v2  ;;  %v2006_v53 = vld [vmem:[%s2484_s30 + $0x94] sm:$0xf]  ;;  %v1809_v54 = vor.u32 %v2040_v46, %v1806_v47  ;;  %v1670_v56 = vld [vmem:[%s2484_s30 + $0x98] sm:$0xf0]  ;;  %v1609_v63 = vor.u32 %v1990_v51, %v1606_v52  ;;  %v1988_v3 = vld [vmem:[%s2484_s30 + $0x4] sm:$0xf] }
  0x75   : > { %797 = vmatpush.bf16.msrb.mxu3 %v1841_v6  ;;  %v2022_v57 = vld [vmem:[%s2484_s30 + $0x114] sm:$0xf]  ;;  %v1734_v58 = vld [vmem:[%s2484_s30 + $0x118] sm:$0xf0]  ;;  %v1673_v1 = vor.u32 %v2006_v53, %v1670_v56  ;;  %v1598_v4 = vld [vmem:[%s2484_s30 + $0x8] sm:$0xf0] }
  0x76   : > { %756 = vmatpush.bf16.msrb.mxu0 %v1641_v12  ;;  %v2038_v61 = vld [vmem:[%s2484_s30 + $0x194] sm:$0xf]  ;;  %v1798_v62 = vld [vmem:[%s2484_s30 + $0x198] sm:$0xf0]  ;;  %v1737_v2 = vor.u32 %v2022_v57, %v1734_v58  ;;  %v2004_v5 = vld [vmem:[%s2484_s30 + $0x84] sm:$0xf]  ;;  %v1601_v12 = vor.u32 %v1988_v3, %v1598_v4 }
  0x77   : > { %770 = vmatpush.bf16.msrb.mxu1 %v1705_v13  ;;  %v1801_v6 = vor.u32 %v2038_v61, %v1798_v62  ;;  %v1662_v7 = vld [vmem:[%s2484_s30 + $0x88] sm:$0xf0]  ;;  %v2020_v8 = vld [vmem:[%s2484_s30 + $0x104] sm:$0xf]  ;;  %v1908_v16 = vld [vmem:[%s2484_s30 + $0x270] sm:$0xf] }
  0x78   : > { %784 = vmatpush.bf16.msrb.mxu2 %v1769_v14  ;;  %v1726_v9 = vld [vmem:[%s2484_s30 + $0x108] sm:$0xf0]  ;;  %v2036_v10 = vld [vmem:[%s2484_s30 + $0x184] sm:$0xf]  ;;  %v1665_v13 = vor.u32 %v2004_v5, %v1662_v7  ;;  %v2067_v17 = vld [vmem:[%s2484_s30 + $0x274] sm:$0xf0] }
  0x79   : > { %798 = vmatpush.bf16.msrb.mxu3 %v1833_v18  ;;  %v1790_v11 = vld [vmem:[%s2484_s30 + $0x188] sm:$0xf0]  ;;  %v1729_v14 = vor.u32 %v2020_v8, %v1726_v9  ;;  %v2066_v18 = vld [vmem:[%s2484_s30 + $0x274] sm:$0xf]  ;;  %v1909_v19 = vor.u32 %v2067_v17, %v1908_v16  ;;  %v1910_v20 = vld [vmem:[%s2484_s30 + $0x278] sm:$0xf0] }
  0x7a   : > { %757 = vmatpush.bf16.msrb.mxu0 %v1633_v24  ;;  %v1793_v15 = vor.u32 %v2036_v10, %v1790_v11  ;;  %v1913_v21 = vor.u32 %v2066_v18, %v1910_v20  ;;  %v1902_v22 = vld [vmem:[%s2484_s30 + $0x268] sm:$0xf0]  ;;  %v1892_v24 = vld [vmem:[%s2484_s30 + $0x250] sm:$0xf]  ;;  %v1894_v28 = vld [vmem:[%s2484_s30 + $0x258] sm:$0xf0] }
  0x7b   : > { %771 = vmatpush.bf16.msrb.mxu1 %v1697_v25  ;;  %v2063_v25 = vld [vmem:[%s2484_s30 + $0x254] sm:$0xf0]  ;;  %v1884_v29 = vld [vmem:[%s2484_s30 + $0x240] sm:$0xf]  ;;  %v2060_v32 = vld [vmem:[%s2484_s30 + $0x244] sm:$0xf] }
  0x7c   : > { %785 = vmatpush.bf16.msrb.mxu2 %v1761_v26  ;;  %v2062_v26 = vld [vmem:[%s2484_s30 + $0x254] sm:$0xf]  ;;  %v1893_v27 = vor.u32 %v2063_v25, %v1892_v24  ;;  %v1886_v33 = vld [vmem:[%s2484_s30 + $0x248] sm:$0xf0]  ;;  %v1878_v39 = vld [vmem:[%s2484_s30 + $0x238] sm:$0xf0] }
  0x7d   : > { %799 = vmatpush.bf16.msrb.mxu3 %v1825_v30  ;;  %v2061_v30 = vld [vmem:[%s2484_s30 + $0x244] sm:$0xf0]  ;;  %v1897_v31 = vor.u32 %v2062_v26, %v1894_v28  ;;  %v1889_v35 = vor.u32 %v2060_v32, %v1886_v33  ;;  %v1868_v44 = vld [vmem:[%s2484_s30 + $0x220] sm:$0xf]  ;;  %v2056_v46 = vld [vmem:[%s2484_s30 + $0x224] sm:$0xf] }
  0x7e   : > { %758 = vmatpush.bf16.msrb.mxu0 %v1625_v36  ;;  %v1885_v34 = vor.u32 %v2061_v30, %v1884_v29  ;;  %v1876_v36 = vld [vmem:[%s2484_s30 + $0x230] sm:$0xf]  ;;  %v2666_v41 = vld [vmem:[%s2663_s7] ss:$4 sm:$0x3] }
  0x7f   : > { %772 = vmatpush.bf16.msrb.mxu1 %v1689_v37  ;;  %v2059_v37 = vld [vmem:[%s2484_s30 + $0x234] sm:$0xf0]  ;;  %v374_v43 = vperm.slane %v2666_v41, 0  ;;  %v2057_v45 = vld [vmem:[%s2484_s30 + $0x224] sm:$0xf0] }
  0x80   : > { %786 = vmatpush.bf16.msrb.mxu2 %v1753_v38  ;;  %v2058_v38 = vld [vmem:[%s2484_s30 + $0x234] sm:$0xf]  ;;  %v1877_v40 = vor.u32 %v2059_v37, %v1876_v36  ;;  %v1869_v47 = vor.u32 %v2057_v45, %v1868_v44  ;;  %v1860_v53 = vld [vmem:[%s2484_s30 + $0x210] sm:$0xf]  ;;  %v1862_v58 = vld [vmem:[%s2484_s30 + $0x218] sm:$0xf0] }
  0x81   : > { %800 = vmatpush.bf16.msrb.mxu3 %v1817_v42  ;;  %v1881_v42 = vor.u32 %v2058_v38, %v1878_v39  ;;  %v2054_v56 = vld [vmem:[%s2484_s30 + $0x214] sm:$0xf]  ;;  %v2052_v3 = vld [vmem:[%s2484_s30 + $0x204] sm:$0xf]  ;;  %v1854_v7 = vld [vmem:[%s2484_s30 + $0x208] sm:$0xf0] }
  0x82   : > { %759 = vmatpush.bf16.msrb.mxu0 %v1617_v48  ;;  %v1870_v48 = vld [vmem:[%s2484_s30 + $0x228] sm:$0xf0]  ;;  %v1865_v62 = vor.u32 %v2054_v56, %v1862_v58  ;;  %v1972_v8 = vld [vmem:[%s2484_s30 + $0x2f0] sm:$0xf]  ;;  %v2083_v9 = vld [vmem:[%s2484_s30 + $0x2f4] sm:$0xf0]  ;;  %v1857_v10 = vor.u32 %v2052_v3, %v1854_v7 }
  0x83   : > { %773 = vmatpush.bf16.msrb.mxu1 %v1681_v49  ;;  %v1873_v49 = vor.u32 %v2056_v46, %v1870_v48  ;;  %v1973_v11 = vor.u32 %v2083_v9, %v1972_v8  ;;  %v1964_v20 = vld [vmem:[%s2484_s30 + $0x2e0] sm:$0xf]  ;;  %v1956_v28 = vld [vmem:[%s2484_s30 + $0x2d0] sm:$0xf]  ;;  %v2079_v29 = vld [vmem:[%s2484_s30 + $0x2d4] sm:$0xf0] }
  0x84   : > { %787 = vmatpush.bf16.msrb.mxu2 %v1745_v50  ;;  %v2078_v30 = vld [vmem:[%s2484_s30 + $0x2d4] sm:$0xf]  ;;  %v1958_v32 = vld [vmem:[%s2484_s30 + $0x2d8] sm:$0xf0]  ;;  %v1948_v36 = vld [vmem:[%s2484_s30 + $0x2c0] sm:$0xf] }
  0x85   : > { %801 = vmatpush.bf16.msrb.mxu3 %v1809_v54  ;;  %v2055_v54 = vld [vmem:[%s2484_s30 + $0x214] sm:$0xf0]  ;;  %v2077_v37 = vld [vmem:[%s2484_s30 + $0x2c4] sm:$0xf0]  ;;  %v2076_v38 = vld [vmem:[%s2484_s30 + $0x2c4] sm:$0xf] }
  0x86   : > { %760 = vmatpush.bf16.msrb.mxu0 %v1609_v63  ;;  %v1861_v57 = vor.u32 %v2055_v54, %v1860_v53  ;;  %v1950_v39 = vld [vmem:[%s2484_s30 + $0x2c8] sm:$0xf0]  ;;  %v1940_v44 = vld [vmem:[%s2484_s30 + $0x2b0] sm:$0xf]  ;;  %v2075_v45 = vld [vmem:[%s2484_s30 + $0x2b4] sm:$0xf0] }
  0x87   : > { %774 = vmatpush.bf16.msrb.mxu1 %v1673_v1  ;;  %v1852_v1 = vld [vmem:[%s2484_s30 + $0x200] sm:$0xf]  ;;  %v2074_v46 = vld [vmem:[%s2484_s30 + $0x2b4] sm:$0xf]  ;;  %v2073_v54 = vld [vmem:[%s2484_s30 + $0x2a4] sm:$0xf0] }
  0x88   : > { %788 = vmatpush.bf16.msrb.mxu2 %v1737_v2  ;;  %v2053_v2 = vld [vmem:[%s2484_s30 + $0x204] sm:$0xf0]  ;;  %v1932_v53 = vld [vmem:[%s2484_s30 + $0x2a0] sm:$0xf]  ;;  %v2072_v56 = vld [vmem:[%s2484_s30 + $0x2a4] sm:$0xf] }
  0x89   : > { %802 = vmatpush.bf16.msrb.mxu3 %v1801_v6  ;;  %v1853_v6 = vor.u32 %v2053_v2, %v1852_v1  ;;  %v1924_v2 = vld [vmem:[%s2484_s30 + $0x290] sm:$0xf]  ;;  %v2071_v3 = vld [vmem:[%s2484_s30 + $0x294] sm:$0xf0] }
  0x8a   : > { %761 = vmatpush.bf16.msrb.mxu0 %v1601_v12  ;;  %v2082_v12 = vld [vmem:[%s2484_s30 + $0x2f4] sm:$0xf] }
  0x8b   : > { %775 = vmatpush.bf16.msrb.mxu1 %v1665_v13  ;;  %v1974_v13 = vld [vmem:[%s2484_s30 + $0x2f8] sm:$0xf0] }
  0x8c   : > { %789 = vmatpush.bf16.msrb.mxu2 %v1729_v14  ;;  %v1977_v16 = vor.u32 %v2082_v12, %v1974_v13  ;;  %v2069_v12 = vld [vmem:[%s2484_s30 + $0x284] sm:$0xf0]  ;;  %v2068_v13 = vld [vmem:[%s2484_s30 + $0x284] sm:$0xf] }
  0x8d   : > { %803 = vmatpush.bf16.msrb.mxu3 %v1793_v15  ;;  %762 = vmatmul.bf16.vlgmr.msrb.gmra.mxu0 %v2578_v59  ;;  %v1900_v59 = vld [vmem:[%s2484_s30 + $0x260] sm:$0xf] }
  0x8e   : > { %776 = vmatmul.bf16.vlgmr.msrb.gmra.mxu1 %v2584_v0  ;;  %1013 = vmatpush.bf16.msra.mxu0 %v1909_v19  ;;  %v2065_v0 = vld [vmem:[%s2484_s30 + $0x264] sm:$0xf0] }
  0x8f   : > { %790 = vmatmul.bf16.vlgmr.msrb.gmra.mxu2 %v2573_v55  ;;  %v2064_v55 = vld [vmem:[%s2484_s30 + $0x264] sm:$0xf]  ;;  %1027 = vmatpush.bf16.msra.mxu1 %v1973_v11 }
  0x90   : > { %804 = vmatmul.bf16.vlgmr.msrb.gmra.mxu3 %v2580_v60  ;;  %1041 = vmatpush.bf16.msra.mxu2 %v1913_v21  ;;  %v1901_v60 = vor.u32 %v2065_v0, %v1900_v59  ;;  %v1905_v23 = vor.u32 %v2064_v55, %v1902_v22  ;;  %v2081_v59 = vld [vmem:[%s2484_s30 + $0x2e4] sm:$0xf0]  ;;  %v2080_v0 = vld [vmem:[%s2484_s30 + $0x2e4] sm:$0xf]  ;;  %v1966_v55 = vld [vmem:[%s2484_s30 + $0x2e8] sm:$0xf0] }
  0x91   : > { %1055 = vmatpush.bf16.msra.mxu3 %v1977_v16  ;;  %v1965_v22 = vor.u32 %v2081_v59, %v1964_v20 }
  0x92   : > { %1014 = vmatpush.bf16.msra.mxu0 %v1901_v60 }
  0x93   : > { %1028 = vmatpush.bf16.msra.mxu1 %v1965_v22 }
  0x94   : > { %1042 = vmatpush.bf16.msra.mxu2 %v1905_v23  ;;  %v1969_v23 = vor.u32 %v2080_v0, %v1966_v55 }
  0x96   : > { %1015 = vmatpush.bf16.msra.mxu0 %v1893_v27  ;;  %1056 = vmatpush.bf16.msra.mxu3 %v1969_v23 }
  0x98   : > { %1043 = vmatpush.bf16.msra.mxu2 %v1897_v31  ;;  %v1957_v31 = vor.u32 %v2079_v29, %v1956_v28 }
  0x9a   : > { %1016 = vmatpush.bf16.msra.mxu0 %v1885_v34  ;;  %1029 = vmatpush.bf16.msra.mxu1 %v1957_v31 }
  0x9c   : > { %1044 = vmatpush.bf16.msra.mxu2 %v1889_v35  ;;  %v1961_v35 = vor.u32 %v2078_v30, %v1958_v32 }
  0x9e   : > { %1017 = vmatpush.bf16.msra.mxu0 %v1877_v40  ;;  %1057 = vmatpush.bf16.msra.mxu3 %v1961_v35 }
  0xa0   : > { %1045 = vmatpush.bf16.msra.mxu2 %v1881_v42  ;;  %v1949_v42 = vor.u32 %v2077_v37, %v1948_v36 }
  0xa2   : > { %1018 = vmatpush.bf16.msra.mxu0 %v1869_v47  ;;  %v1942_v47 = vld [vmem:[%s2484_s30 + $0x2b8] sm:$0xf0]  ;;  %1030 = vmatpush.bf16.msra.mxu1 %v1949_v42 }
  0xa4   : > { %1046 = vmatpush.bf16.msra.mxu2 %v1873_v49 }
  0xa6   : > { %1019 = vmatpush.bf16.msra.mxu0 %v1861_v57  ;;  %v1934_v57 = vld [vmem:[%s2484_s30 + $0x2a8] sm:$0xf0] }
  0xa7   : > { %v1937_v1 = vor.u32 %v2072_v56, %v1934_v57  ;;  %v1591_v57 = vld [vmem:[%s2663_s7 + $0x1] ss:$4 sm:$0x3] }
  0xa8   : > { %1047 = vmatpush.bf16.msra.mxu2 %v1865_v62 }
  0xaa   : > { %1020 = vmatpush.bf16.msra.mxu0 %v1853_v6 }
  0xac   : > { %1048 = vmatpush.bf16.msra.mxu2 %v1857_v10  ;;  %v1916_v10 = vld [vmem:[%s2484_s30 + $0x280] sm:$0xf] }
  0xea   : > { %v707_v50 = vpop.f32.mrf.mxu0 }
  0xeb   : > { %v708_v51 = vadd.f32 %v707_v50, %v374_v43  ;;  %v721_v52 = vpop.f32.mrf.mxu1 }
  0xed   : > { %v722_v61 = vadd.f32 %v721_v52, %v708_v51  ;;  %v1941_v51 = vor.u32 %v2075_v45, %v1940_v44  ;;  %v1945_v52 = vor.u32 %v2074_v46, %v1942_v47 }
  0xef   : > { %1031 = vmatpush.bf16.msra.mxu1 %v1941_v51 }
  0xf2   : > { %v735_v63 = vpop.f32.mrf.mxu2  ;;  %v709_v15 = vpop.f32.mrf.mxu0 }
  0xf3   : > { %v736_v4 = vadd.f32 %v735_v63, %v722_v61  ;;  %v749_v5 = vpop.f32.mrf.mxu3  ;;  %v710_v17 = vadd.f32 %v709_v15, %v374_v43  ;;  %v723_v18 = vpop.f32.mrf.mxu1  ;;  %v1953_v43 = vor.u32 %v2076_v38, %v1950_v39  ;;  %v375_v61 = vperm.slane %v2666_v41, 1  ;;  %v1918_v15 = vld [vmem:[%s2484_s30 + $0x288] sm:$0xf0] }
  0xf4   : > { %v1933_v63 = vor.u32 %v2073_v54, %v1932_v53  ;;  %v1925_v41 = vor.u32 %v2071_v3, %v1924_v2  ;;  %v1921_v20 = vor.u32 %v2068_v13, %v1918_v15  ;;  %v850_v2 = vperm.slane %v1591_v57, 1 }
  0xf5   : > { %v2685_v14 = vadd.f32 %v749_v5, %v736_v4  ;;  %v724_v21 = vadd.f32 %v723_v18, %v710_v17  ;;  %1058 = vmatpush.bf16.msra.mxu3 %v1953_v43  ;;  %v2070_v4 = vld [vmem:[%s2484_s30 + $0x294] sm:$0xf]  ;;  %v1926_v5 = vld [vmem:[%s2484_s30 + $0x298] sm:$0xf0] }
  0xf6   : > { %1032 = vmatpush.bf16.msra.mxu1 %v1933_v63  ;;  %v1929_v9 = vor.u32 %v2070_v4, %v1926_v5 }
  0xf7   : > { %v814_v19 = vmul.f32 0.044715, %v2685_v14  ;;  %v810_v59 = vmul.f32 0.5, %v2685_v14 }
  0xf9   : > { %v818_v60 = vmul.f32 %v814_v19, %v2685_v14  ;;  %1059 = vmatpush.bf16.msra.mxu3 %v1945_v52  ;;  %v1917_v19 = vor.u32 %v2069_v12, %v1916_v10 }
  0xfa   : > { %v737_v24 = vpop.f32.mrf.mxu2  ;;  %1033 = vmatpush.bf16.msra.mxu1 %v1925_v41 }
  0xfb   : > { %v738_v25 = vadd.f32 %v737_v24, %v724_v21  ;;  %v751_v26 = vpop.f32.mrf.mxu3  ;;  %v822_v27 = vmul.f32 %v818_v60, %v2685_v14 }
  0xfd   : > { %v2698_v33 = vadd.f32 %v751_v26, %v738_v25  ;;  %v826_v34 = vadd.f32 %v822_v27, %v2685_v14  ;;  %1060 = vmatpush.bf16.msra.mxu3 %v1937_v1 }
  0xfe   : > { %1034 = vmatpush.bf16.msra.mxu1 %v1917_v19 }
  0xff   : > { %v816_v40 = vmul.f32 0.044715, %v2698_v33  ;;  %v830_v49 = vmul.f32 0.7978846, %v826_v34  ;;  %v812_v0 = vmul.f32 0.5, %v2698_v33 }
 0x101   : > { %v820_v48 = vmul.f32 %v816_v40, %v2698_v33  ;;  %2151 = vtanh.f32 %v830_v49  ;;  %1061 = vmatpush.bf16.msra.mxu3 %v1929_v9 }
 0x103   : > { %v824_v50 = vmul.f32 %v820_v48, %v2698_v33 }
 0x105   : > { %v828_v58 = vadd.f32 %v824_v50, %v2698_v33  ;;  %1062 = vmatpush.bf16.msra.mxu3 %v1921_v20 }
 0x107   : > { %v832_v62 = vmul.f32 0.7978846, %v828_v58  ;;  %v2152_v8 = vpop.eup %2151 }
 0x108   : > { %v838_v17 = vadd.f32 1.0, %v2152_v8 }
 0x109   : > { %2153 = vtanh.f32 %v832_v62 }
 0x10a   : > { %v763_v6 = vpop.f32.mrf.mxu0  ;;  %v842_v24 = vmul.f32 %v838_v17, %v810_v59 }
 0x10b   : > { %v764_v7 = vadd.f32 %v763_v6, %v375_v61  ;;  %v777_v11 = vpop.f32.mrf.mxu1 }
 0x10d   : > { %v778_v16 = vadd.f32 %v777_v11, %v764_v7 }
 0x10f   : > { %v2154_v18 = vpop.eup %2153 }
 0x110   : > { %v840_v55 = vadd.f32 1.0, %v2154_v18 }
 0x112   : > { %v791_v21 = vpop.f32.mrf.mxu2  ;;  %v765_v23 = vpop.f32.mrf.mxu0  ;;  %v844_v25 = vmul.f32 %v840_v55, %v812_v0 }
 0x113   : > { %v792_v60 = vadd.f32 %v791_v21, %v778_v16  ;;  %v805_v22 = vpop.f32.mrf.mxu3  ;;  %v766_v27 = vadd.f32 %v765_v23, %v375_v61  ;;  %v779_v30 = vpop.f32.mrf.mxu1  ;;  %v849_v61 = vperm.slane %v1591_v57, 0 }
 0x114   : > { %v846_v28 = vpack.c.bf16 %v844_v25, %v842_v24 }
 0x115   : > { %v806_v26 = vadd.f32 %v805_v22, %v792_v60  ;;  %v780_v31 = vadd.f32 %v779_v30, %v766_v27 }
 0x116   : > { %1021 = vmatmul.bf16.vlgmr.msra.gmra.mxu0 %v846_v28  ;;  %1049 = vmatmul.bf16.vlgmr.msra.gmra.mxu2 %v846_v28 }
 0x117   : > { %v815_v29 = vmul.f32 0.044715, %v806_v26  ;;  %v811_v50 = vmul.f32 0.5, %v806_v26 }
 0x119   : > { %v819_v32 = vmul.f32 %v815_v29, %v806_v26 }
 0x11a   : > { %v793_v34 = vpop.f32.mrf.mxu2 }
 0x11b   : > { %v794_v35 = vadd.f32 %v793_v34, %v780_v31  ;;  %v823_v36 = vmul.f32 %v819_v32, %v806_v26  ;;  %v807_v37 = vpop.f32.mrf.mxu3 }
 0x11d   : > { %v808_v38 = vadd.f32 %v807_v37, %v794_v35  ;;  %v827_v39 = vadd.f32 %v823_v36, %v806_v26 }
 0x11f   : > { %v817_v40 = vmul.f32 0.044715, %v808_v38  ;;  %v831_v43 = vmul.f32 0.7978846, %v827_v39  ;;  %v813_v51 = vmul.f32 0.5, %v808_v38 }
 0x121   : > { %v821_v42 = vmul.f32 %v817_v40, %v808_v38  ;;  %2155 = vtanh.f32 %v831_v43  ;;  %v1592_v40 = vld [vmem:[%s2663_s7 + $0x2] ss:$4 sm:$0x3] }
 0x123   : > { %v825_v44 = vmul.f32 %v821_v42, %v808_v38 }
 0x125   : > { %v829_v45 = vadd.f32 %v825_v44, %v808_v38  ;;  %v1593_v44 = vld [vmem:[%s2663_s7 + $0x3] ss:$4 sm:$0x3] }
 0x127   : > { %v833_v46 = vmul.f32 0.7978846, %v829_v45  ;;  %v2156_v47 = vpop.eup %2155 }
 0x128   : > { %v839_v48 = vadd.f32 1.0, %v2156_v47  ;;  %v1128_v47 = vperm.slane %v1592_v40, 0 }
 0x129   : > { %2157 = vtanh.f32 %v833_v46 }
 0x12a   : > { %v843_v53 = vmul.f32 %v839_v48, %v811_v50  ;;  %v1129_v48 = vperm.slane %v1592_v40, 1 }
 0x12f   : > { %v2158_v49 = vpop.eup %2157 }
 0x130   : > { %v841_v52 = vadd.f32 1.0, %v2158_v49 }
 0x132   : > { %v845_v54 = vmul.f32 %v841_v52, %v813_v51 }
 0x134   : > { %v847_v56 = vpack.c.bf16 %v845_v54, %v843_v53  ;;  %v1137_v53 = vperm.slane %v1593_v44, 0  ;;  %v1138_v54 = vperm.slane %v1593_v44, 1 }
 0x136   : > { %1035 = vmatmul.bf16.vlgmr.msra.gmra.mxu1 %v847_v56  ;;  %1063 = vmatmul.bf16.vlgmr.msra.gmra.mxu3 %v847_v56 }
 0x193   : > { %v1022_v58 = vpop.f32.mrf.mxu0 }
 0x194   : > { %v1023_v1 = vadd.f32 %v1022_v58, %v849_v61 }
 0x199   : > { %v1050_v62 = vpop.f32.mrf.mxu2 }
 0x19a   : > { %v1051_v4 = vadd.f32 %v1050_v62, %v850_v2 }
 0x19b   : > { %v1024_v5 = vpop.f32.mrf.mxu0 }
 0x19c   : > { %v1025_v9 = vadd.f32 %v1024_v5, %v849_v61 }
 0x1a1   : > { %v1052_v11 = vpop.f32.mrf.mxu2 }
 0x1a2   : > { %v1053_v17 = vadd.f32 %v1052_v11, %v850_v2 }
 0x1b3   : > { %v1036_v63 = vpop.f32.mrf.mxu1 }
 0x1b4   : > { %v1037_v3 = vadd.f32 %v1036_v63, %v1023_v1 }
 0x1b6   : > { %v1069_v7 = vadd.f32 %v1037_v3, %v2685_v14 }
 0x1b8   : > { %v1081_v15 = vmul.f32 %v1069_v7, %v1069_v7 }
 0x1b9   : > { %v1064_v6 = vpop.f32.mrf.mxu3 }
 0x1ba   : > { %v1065_v8 = vadd.f32 %v1064_v6, %v1051_v4 }
 0x1bb   : > { %v1038_v41 = vpop.f32.mrf.mxu1 }
 0x1bc   : > { %v1070_v10 = vadd.f32 %v1065_v8, %v806_v26  ;;  %v1039_v12 = vadd.f32 %v1038_v41, %v1025_v9 }
 0x1be   : > { %v1073_v13 = vadd.f32 %v1070_v10, %v1069_v7  ;;  %v1082_v16 = vmul.f32 %v1070_v10, %v1070_v10  ;;  %v2731_v20 = vadd.f32 %v1039_v12, %v2698_v33 }
 0x1c0   : > { %1074 = vadd.xlane.f32.xlu0 %v1073_v13  ;;  %v1085_v18 = vadd.f32 %v1082_v16, %v1081_v15  ;;  %v1083_v0 = vmul.f32 %v2731_v20, %v2731_v20 }
 0x1c1   : > { %v1066_v19 = vpop.f32.mrf.mxu3 }
 0x1c2   : > { %v1067_v21 = vadd.f32 %v1066_v19, %v1053_v17  ;;  %1086 = vadd.xlane.f32.xlu1 %v1085_v18 }
 0x1c4   : > { %v1072_v59 = vadd.f32 %v1067_v21, %v808_v38 }
 0x1c6   : > { %v1076_v14 = vadd.f32 %v1072_v59, %v2731_v20  ;;  %v1084_v55 = vmul.f32 %v1072_v59, %v1072_v59 }
 0x1c8   : > { %1077 = vadd.xlane.f32.xlu0 %v1076_v14  ;;  %v1088_v60 = vadd.f32 %v1084_v55, %v1083_v0 }
 0x1ca   : > { %1089 = vadd.xlane.f32.xlu1 %v1088_v60 }
 0x233   : > { %v1075_v22 = vpop.xlane.xlu0 %1074 }
 0x234   : > { %v1079_v23 = vmul.f32 0.00390625, %v1075_v22 }
 0x235   : > { %v1087_v24 = vpop.xlane.xlu1 %1086 }
 0x236   : > { %v1091_v25 = vmul.f32 0.00390625, %v1087_v24  ;;  %v1093_v26 = vmul.f32 %v1079_v23, %v1079_v23  ;;  %v1097_v49 = vsub.f32 %v1069_v7, %v1079_v23  ;;  %v1098_v50 = vsub.f32 %v1070_v10, %v1079_v23 }
 0x238   : > { %v1095_v33 = vsub.f32 %v1091_v25, %v1093_v26 }
 0x23a   : > { %v1101_v27 = vadd.f32 1e-05, %v1095_v33 }
 0x23b   : > { %v1078_v28 = vpop.xlane.xlu0 %1077 }
 0x23c   : > { %2159 = vrsqrt.f32 %v1101_v27  ;;  %v1080_v29 = vmul.f32 0.00390625, %v1078_v28  ;;  %vm1109_vm1 = vweird.f32 %v1101_v27 }
 0x23d   : > { %v1090_v30 = vpop.xlane.xlu1 %1089 }
 0x23e   : > { %v1092_v31 = vmul.f32 0.00390625, %v1090_v30  ;;  %v1094_v32 = vmul.f32 %v1080_v29, %v1080_v29  ;;  %v1099_v4 = vsub.f32 %v2731_v20, %v1080_v29  ;;  %v1100_v5 = vsub.f32 %v1072_v59, %v1080_v29 }
 0x240   : > { %v1096_v34 = vsub.f32 %v1092_v31, %v1094_v32 }
 0x242   : > { %v2160_v35 = vpop.eup %2159  ;;  %v1102_v36 = vadd.f32 1e-05, %v1096_v34 }
 0x243   : > { %v1104_v37 = vmul.f32 %v2160_v35, %v1101_v27  ;;  %vm1110_vm0 = vweird.f32 %v2160_v35 }
 0x244   : > { %2161 = vrsqrt.f32 %v1102_v36  ;;  %vm1111_vm2 = vmor %vm1109_vm1, %vm1110_vm0  ;;  %vm1119_vm4 = vweird.f32 %v1102_v36 }
 0x245   : > { %v1105_v38 = vmul.f32 %v2160_v35, %v1104_v37 }
 0x247   : > { %v1106_v39 = vmul.f32 0.5, %v1105_v38 }
 0x249   : > { %v1107_v42 = vsub.f32 1.5, %v1106_v39 }
 0x24a   : > { %v2162_v43 = vpop.eup %2161 }
 0x24b   : > { %v1108_v45 = vmul.f32 %v2160_v35, %v1107_v42  ;;  %v1114_v46 = vmul.f32 %v2162_v43, %v1102_v36  ;;  %vm1120_vm3 = vweird.f32 %v2162_v43 }
 0x24c   : > { %vm1121_vm5 = vmor %vm1119_vm4, %vm1120_vm3 }
 0x24d   : > { %v1112_v51 = vsel %vm1111_vm2, %v2160_v35, %v1108_v45  ;;  %v1115_v52 = vmul.f32 %v2162_v43, %v1114_v46 }
 0x24e   : > { %v1123_v56 = vmul.f32 %v1112_v51, %v1097_v49  ;;  %v1124_v57 = vmul.f32 %v1112_v51, %v1098_v50 }
 0x24f   : > { %v1116_v58 = vmul.f32 0.5, %v1115_v52 }
 0x250   : > { %v1132_v61 = vmul.f32 %v1128_v47, %v1123_v56  ;;  %v1133_v62 = vmul.f32 %v1129_v48, %v1124_v57 }
 0x251   : > { %v1117_v63 = vsub.f32 1.5, %v1116_v58 }
 0x252   : > { %v1141_v1 = vadd.f32 %v1137_v53, %v1132_v61  ;;  %v1142_v2 = vadd.f32 %v1138_v54, %v1133_v62 }
 0x253   : > { %v1118_v3 = vmul.f32 %v2162_v43, %v1117_v63 }
 0x255   : > { %v1122_v6 = vsel %vm1121_vm5, %v2162_v43, %v1118_v3 }
 0x256   : > { %v1125_v7 = vmul.f32 %v1122_v6, %v1099_v4  ;;  %v1126_v8 = vmul.f32 %v1122_v6, %v1100_v5  ;;  %1148 = sbr.rel (%p1978_p7) target bundleno = 607 (0x25f), region = 48 }
 0x258   : > { %v1134_v41 = vmul.f32 %v1128_v47, %v1125_v7  ;;  %v1135_v9 = vmul.f32 %v1129_v48, %v1126_v8 }
 0x25a   : > { %v1143_v10 = vadd.f32 %v1137_v53, %v1134_v41  ;;  %v1144_v11 = vadd.f32 %v1138_v54, %v1135_v9 }
 0x25b   : > { %1149 = vst [vmem:[#allocation2 + $0x10] sm:$0xff] %v1141_v1 }
 0x25c   : > { %1150 = vst [vmem:[#allocation2] sm:$0xff] %v1142_v2 }
 0x25d   : > { %1151 = vst [vmem:[#allocation2 + $0x18] sm:$0xff] %v1143_v10 }
 0x25e   : > { %1152 = vst [vmem:[#allocation2 + $0x8] sm:$0xff] %v1144_v11 }
 0x25f PF: > { %p1979_p8 = scmp.ne.s32.totalorder %s2379_s16, 1 }
 0x261   : > { %1156 = sbr.rel (%p1979_p8) target bundleno = 1365 (0x555), region = 52 }
 0x266   : > { %1221 = vmatpush.xpose.msra.mxu2 %v1143_v10  ;;  %1244 = vmatpush.xpose.msra.mxu3 %v1144_v11  ;;  %v1159_v12 = vld [vmem:[#allocation2 + $0x18] sm:$0xff]  ;;  %v1157_v13 = vld [vmem:[#allocation2 + $0x10] sm:$0xff]  ;;  %v1160_v15 = vld [vmem:[#allocation2 + $0x8] sm:$0xff]  ;;  %vm1347_vm6 = vcmask 130048   ;;  %vm1463_vm7 = vcmask 7168  }
 0x267   : > { %2084 = vmatpush.xpose.msra.mxu1 %v1159_v12  ;;  %1175 = vmatpush.xpose.msra.mxu0 %v1159_v12  ;;  %v1158_v16 = vld [vmem:[#allocation2] sm:$0xff] }
 0x26a   : > { %1222 = vmatpush.xpose.msra.mxu2 %v1141_v1  ;;  %1245 = vmatpush.xpose.msra.mxu3 %v1142_v2 }
 0x26b   : > { %2085 = vmatpush.xpose.msra.mxu1 %v1157_v13  ;;  %1176 = vmatpush.xpose.msra.mxu0 %v1157_v13 }
 0x26d   : > { %1223 = vmatmul.f32.vlgmr.msra.gmra.mxu2 %v1157_v13  ;;  %1246 = vmatmul.f32.vlgmr.msra.gmra.mxu3 %v1158_v16 }
 0x26e   : > { %1313 = vmatpush.xpose.msrb.mxu2 %v1143_v10  ;;  %1180 = vmatmul.f32.vlgmr.msra.gmra.mxu1 %v1143_v10 }
 0x26f   : > { %1198 = vmatpush.xpose.msrb.mxu1 %v1160_v15  ;;  %1336 = vmatpush.xpose.msrb.mxu3 %v1144_v11 }
 0x270   : > { %1177 = vmatmul.f32.vlgmr.msra.gmra.mxu0 %v1141_v1 }
 0x271   : > { %1267 = vmatpush.xpose.msrb.mxu0 %v1159_v12 }
 0x272   : > { %1314 = vmatpush.xpose.msrb.mxu2 %v1141_v1 }
 0x273   : > { %1199 = vmatpush.xpose.msrb.mxu1 %v1158_v16  ;;  %1337 = vmatpush.xpose.msrb.mxu3 %v1142_v2 }
 0x275   : > { %1268 = vmatpush.xpose.msrb.mxu0 %v1157_v13  ;;  %1226 = vmatmul.f32.gmra.mxu2 %v1159_v12 }
 0x276   : > { %1249 = vmatmul.f32.gmra.mxu3 %v1160_v15  ;;  %1200 = vmatmul.f32.vlgmr.msrb.gmra.mxu1 %v1142_v2 }
 0x277   : > { %1290 = vmatpush.xpose.msra.mxu1 %v1160_v15 }
 0x278   : > { %1269 = vmatmul.f32.vlgmr.msrb.gmra.mxu0 %v1157_v13 }
 0x27b   : > { %1291 = vmatpush.xpose.msra.mxu1 %v1158_v16 }
 0x27d   : > { %1315 = vmatmul.f32.vlgmr.msrb.gmra.mxu2 %v1141_v1 }
 0x27e   : > { %1338 = vmatmul.f32.vlgmr.msrb.gmra.mxu3 %v1142_v2  ;;  %1203 = vmatmul.f32.gmra.mxu1 %v1144_v11 }
 0x280   : > { %1272 = vmatmul.f32.gmra.mxu0 %v1159_v12 }
 0x285   : > { %1318 = vmatmul.f32.gmra.mxu2 %v1143_v10 }
 0x286   : > { %1341 = vmatmul.f32.gmra.mxu3 %v1144_v11  ;;  %1292 = vmatmul.f32.vlgmr.msra.gmra.mxu1 %v1158_v16 }
 0x28e   : > { %1295 = vmatmul.f32.gmra.mxu1 %v1160_v15 }
 0x2eb   : > { %v1181_v17 = vpop.f32.mrf.mxu1 }
 0x2ed   : > { %v1178_v20 = vpop.f32.mrf.mxu0 }
 0x2f0   : > { %v1224_v18 = vpop.f32.mrf.mxu2  ;;  %v1247_v19 = vpop.f32.mrf.mxu3 }
 0x2f1   : > { %v1248_v24 = vadd.f32 %v1247_v19, %v1224_v18 }
 0x2f3   : > { %v1201_v21 = vpop.f32.mrf.mxu1  ;;  %v1396_v27 = vsel %vm1347_vm6, %v1248_v24, -inf }
 0x2f4   : > { %v2741_v59 = vadd.f32 %v1201_v21, %v1178_v20 }
 0x2f5   : > { %v1270_v25 = vpop.f32.mrf.mxu0 }
 0x2f6   : > { %v1370_v2 = vsel %vm1347_vm6, %v2741_v59, -inf }
 0x2f8   : > { %v1227_v14 = vpop.f32.mrf.mxu2 }
 0x2f9   : > { %v1250_v0 = vpop.f32.mrf.mxu3 }
 0x2fa   : > { %v1251_v55 = vadd.f32 %v1250_v0, %v1227_v14 }
 0x2fb   : > { %v1204_v60 = vpop.f32.mrf.mxu1 }
 0x2fc   : > { %v1399_v22 = vsel %vm1347_vm6, %v1251_v55, -inf  ;;  %v2744_v23 = vadd.f32 %v1204_v60, %v1181_v17 }
 0x2fd   : > { %1400 = vmax.xlane.f32.xlu0 %v1399_v22  ;;  %v1273_v32 = vpop.f32.mrf.mxu0 }
 0x2fe   : > { %v1373_v5 = vsel %vm1347_vm6, %v2744_v23, -inf }
 0x300   : > { %v1316_v26 = vpop.f32.mrf.mxu2 }
 0x301   : > { %v1339_v28 = vpop.f32.mrf.mxu3 }
 0x303   : > { %v1293_v33 = vpop.f32.mrf.mxu1 }
 0x304   : > { %v1294_v29 = vadd.f32 %v1293_v33, %v1270_v25 }
 0x305   : > { %1397 = vmax.xlane.f32.xlu0 %v1396_v27 }
 0x306   : > { %v1317_v30 = vadd.f32 %v1316_v26, %v1294_v29 }
 0x308   : > { %v1340_v31 = vadd.f32 %v1339_v28, %v1317_v30  ;;  %v1319_v36 = vpop.f32.mrf.mxu2 }
 0x309   : > { %v1342_v39 = vpop.f32.mrf.mxu3 }
 0x30a   : > { %v1345_v34 = vmul.f32 0.5, %v1340_v31 }
 0x30b   : > { %v1296_v35 = vpop.f32.mrf.mxu1 }
 0x30c   : > { %v1297_v37 = vadd.f32 %v1296_v35, %v1273_v32  ;;  %v1348_v38 = vsel %vm1347_vm6, %v1345_v34, -inf }
 0x30d   : > { %1349 = vmax.xlane.f32.xlu1 %v1348_v38 }
 0x30e   : > { %v1320_v40 = vadd.f32 %v1319_v36, %v1297_v37 }
 0x310   : > { %v1343_v42 = vadd.f32 %v1342_v39, %v1320_v40 }
 0x312   : > { %v1346_v43 = vmul.f32 0.5, %v1343_v42 }
 0x314   : > { %v1351_v44 = vsel %vm1347_vm6, %v1346_v43, -inf }
 0x315   : > { %1352 = vmax.xlane.f32.xlu1 %v1351_v44 }
 0x370   : > { %v1401_v45 = vpop.xlane.xlu0 %1400 }
 0x371   : > { %v1403_v46 = vsub.f32 %v1251_v55, %v1401_v45 }
 0x373   : > { %v1406_v47 = vmul.f32 1.442695, %v1403_v46 }
 0x375   : > { %2163 = vpow2.f32 %v1406_v47 }
 0x378   : > { %v1398_v48 = vpop.xlane.xlu0 %1397 }
 0x379   : > { %v1402_v49 = vsub.f32 %v1248_v24, %v1398_v48 }
 0x37b   : > { %v2164_v50 = vpop.eup %2163  ;;  %v1404_v51 = vmul.f32 1.442695, %v1402_v49 }
 0x37c   : > { %v1411_v52 = vsel %vm1347_vm6, %v2164_v50, 0.0 }
 0x37d   : > { %2165 = vpow2.f32 %v1404_v51  ;;  %1412 = vadd.xlane.f32.xlu2 %v1411_v52 }
 0x380   : > { %v1350_v53 = vpop.xlane.xlu1 %1349 }
 0x381   : > { %v1354_v54 = vsub.f32 %v1345_v34, %v1350_v53 }
 0x383   : > { %v2166_v56 = vpop.eup %2165  ;;  %v1356_v57 = vmul.f32 1.442695, %v1354_v54 }
 0x384   : > { %v1408_v58 = vsel %vm1347_vm6, %v2166_v56, 0.0 }
 0x385   : > { %1409 = vadd.xlane.f32.xlu2 %v1408_v58  ;;  %2167 = vpow2.f32 %v1356_v57 }
 0x388   : > { %v1353_v61 = vpop.xlane.xlu1 %1352 }
 0x389   : > { %v1355_v62 = vsub.f32 %v1346_v43, %v1353_v61 }
 0x38b   : > { %v2168_v63 = vpop.eup %2167  ;;  %v1358_v1 = vmul.f32 1.442695, %v1355_v62 }
 0x38c   : > { %v1360_v3 = vsel %vm1347_vm6, %v2168_v63, 0.0 }
 0x38d   : > { %1371 = vmax.xlane.f32.xlu2 %v1370_v2  ;;  %2169 = vpow2.f32 %v1358_v1  ;;  %1361 = vadd.xlane.f32.xlu0 %v1360_v3 }
 0x393   : > { %v2170_v4 = vpop.eup %2169 }
 0x394   : > { %v1363_v6 = vsel %vm1347_vm6, %v2170_v4, 0.0 }
 0x395   : > { %1374 = vmax.xlane.f32.xlu0 %v1373_v5  ;;  %1364 = vadd.xlane.f32.xlu1 %v1363_v6 }
 0x3f0   : > { %v1413_v7 = vpop.xlane.xlu2 %1412 }
 0x3f1   : > { %2171 = vlog2.f32 %v1413_v7 }
 0x3f7   : > { %v2172_v8 = vpop.eup %2171 }
 0x3f8   : > { %v1417_v41 = vmul.f32 0.6931472, %v2172_v8  ;;  %v1410_v9 = vpop.xlane.xlu2 %1409 }
 0x3f9   : > { %2173 = vlog2.f32 %v1410_v9 }
 0x3fa   : > { %v1419_v10 = vadd.f32 %v1417_v41, %v1401_v45 }
 0x3fc   : > { %1452 = vmatpush.msra.mxu0 %v1419_v10 }
 0x3ff   : > { %v2174_v11 = vpop.eup %2173 }
 0x400   : > { %v1415_v12 = vmul.f32 0.6931472, %v2174_v11  ;;  %v1372_v13 = vpop.xlane.xlu2 %1371  ;;  %v1362_v16 = vpop.xlane.xlu0 %1361 }
 0x401   : > { %v1376_v15 = vsub.f32 %v2741_v59, %v1372_v13  ;;  %2175 = vrcp.f32 %v1362_v16 }
 0x402   : > { %v1418_v17 = vadd.f32 %v1415_v12, %v1398_v48 }
 0x403   : > { %v1378_v18 = vmul.f32 1.442695, %v1376_v15 }
 0x404   : > { %1453 = vmatpush.msra.mxu0 %v1418_v17 }
 0x405   : > { %2177 = vpow2.f32 %v1378_v18 }
 0x407   : > { %v2176_v19 = vpop.eup %2175 }
 0x408   : > { %v1368_v20 = vmul.f32 %v2176_v19, %v2168_v63  ;;  %v1375_v21 = vpop.xlane.xlu0 %1374  ;;  %v1365_v14 = vpop.xlane.xlu1 %1364 }
 0x409   : > { %v1377_v0 = vsub.f32 %v2744_v23, %v1375_v21  ;;  %2179 = vrcp.f32 %v1365_v14 }
 0x40a   : > { %1980 = vmatmul.msk.f32.vlgmr.msra.gmra.mxu0 %vm1347_vm6, %v1368_v20  ;;  %v1420_v34 = vsub.f32 0.0, %v1368_v20 }
 0x40b   : > { %v2178_v55 = vpop.eup %2177  ;;  %v1380_v60 = vmul.f32 1.442695, %v1377_v0 }
 0x40c   : > { %v1382_v22 = vsel %vm1347_vm6, %v2178_v55, 0.0 }
 0x40d   : > { %1383 = vadd.xlane.f32.xlu1 %v1382_v22  ;;  %2181 = vpow2.f32 %v1380_v60 }
 0x40f   : > { %v2180_v24 = vpop.eup %2179 }
 0x410   : > { %v1369_v25 = vmul.f32 %v2180_v24, %v2170_v4 }
 0x412   : > { %1981 = vmatmul.msk.f32.gmra.mxu0 %vm1347_vm6, %v1369_v25  ;;  %v1421_v43 = vsub.f32 0.0, %v1369_v25 }
 0x413   : > { %v2182_v26 = vpop.eup %2181 }
 0x414   : > { %v1385_v33 = vsel %vm1347_vm6, %v2182_v26, 0.0 }
 0x415   : > { %1386 = vadd.xlane.f32.xlu2 %v1385_v33 }
 0x480   : > { %v1384_v27 = vpop.xlane.xlu1 %1383 }
 0x481   : > { %2183 = vlog2.f32 %v1384_v27 }
 0x487   : > { %v2184_v28 = vpop.eup %2183  ;;  %v1455_v47 = vpop.f32.mrf.mxu0 }
 0x488   : > { %v1389_v29 = vmul.f32 0.6931472, %v2184_v28  ;;  %v1387_v30 = vpop.xlane.xlu2 %1386 }
 0x489   : > { %2185 = vlog2.f32 %v1387_v30 }
 0x48a   : > { %v1392_v31 = vadd.f32 %v1389_v29, %v1372_v13 }
 0x48c   : > { %v1394_v32 = vsub.f32 %v2741_v59, %v1392_v31 }
 0x48e   : > { %v1422_v35 = vadd.f32 %v1394_v32, %v2741_v59 }
 0x48f   : > { %v2186_v36 = vpop.eup %2185  ;;  %v1458_v59 = vpop.f32.mrf.mxu0 }
 0x490   : > { %v1424_v37 = vmul.f32 %v1422_v35, %v1420_v34  ;;  %v1391_v38 = vmul.f32 0.6931472, %v2186_v36 }
 0x492   : > { %v1426_v39 = vsel %vm1347_vm6, %v1424_v37, 0.0  ;;  %v1393_v40 = vadd.f32 %v1391_v38, %v1375_v21 }
 0x493   : > { %1427 = vadd.xlane.f32.xlu0 %v1426_v39 }
 0x494   : > { %v1395_v42 = vsub.f32 %v2744_v23, %v1393_v40 }
 0x496   : > { %v1423_v44 = vadd.f32 %v1395_v42, %v2744_v23 }
 0x498   : > { %v1425_v45 = vmul.f32 %v1423_v44, %v1421_v43 }
 0x49a   : > { %v1429_v46 = vsel %vm1347_vm6, %v1425_v45, 0.0 }
 0x49b   : > { %1430 = vadd.xlane.f32.xlu1 %v1429_v46 }
 0x506   : > { %v1428_v48 = vpop.xlane.xlu0 %1427 }
 0x507   : > { %v1461_v49 = vadd.f32 %v1455_v47, %v1428_v48 }
 0x509   : > { %v1464_v52 = vsel %vm1463_vm7, %v1461_v49, 0.0 }
 0x50e   : > { %v1431_v50 = vpop.xlane.xlu1 %1430 }
 0x50f   : > { %v1462_v51 = vadd.f32 %v1458_v59, %v1431_v50 }
 0x511   : > { %v1465_v53 = vsel %vm1463_vm7, %v1462_v51, 0.0 }
 0x512   : > { %v1466_v54 = vadd.f32 %v1465_v53, %v1464_v52 }
 0x514   : > { %v1467_v56 = vrot.slane %v1466_v54, 4 }
 0x516   : > { %v1468_v57 = vadd.f32 %v1467_v56, %v1466_v54 }
 0x518   : > { %v1469_v58 = vrot.slane %v1468_v57, 2 }
 0x51a   : > { %v1470_v61 = vadd.f32 %v1469_v58, %v1468_v57 }
 0x51c   : > { %v1471_v62 = vrot.slane %v1470_v61, 1 }
 0x51e   : > { %v1472_v23 = vadd.f32 %v1471_v62, %v1470_v61 }
 0x520   : > { %2089 = vpush %v1472_v23 }
 0x551   : > { %s2090_s8 = spop %2089 }
 0x552   : > { %s1474_s11 = smul.f32 0.03125, %s2090_s8 }
 0x554   : > { %1476 = sst [smem:[#allocation9]] %s1474_s11 }
 0x555 PF: > { %p2112_p10 = scmp.eq.s32.totalorder %s2379_s16, 1  ;;  %s1483_s5 = sshll.u32 %s2789_s3, 4  ;;  %s1484_s5 = int_to_ptr.hbm [resolvable:$true] %s1483_s5 }
 0x556   : > { %s2339_s18 = smov [#allocation9]  }
 0x557   : > { %2098 = dma.smem_to_hbm (%p2112_p10), %s2339_s18, 16, %s1484_s5, [#allocation5]  }
 0x558   : > { %2316 = dma.done.wait (%p2112_p10), [#allocation5], 16  }
 0x559   : > { %2318 = vsyncadd (%p2112_p10), [#allocation5], 4294967280 }
 0x55a   : > { %1492 = sfence }
 0x55b PF: > { %p17_p5 = scmp.ge.s32.totalorder %s2382_s17, 4   ;;  %s2793_s12 = smov %s2325_s13 }
 0x55c   : > { %s2794_s13 = smov %s2329_s14  ;;  %s2795_s14 = smov %s2392_s20 }
 0x55d   : > { %s2796_s15 = smov %s2382_s17  ;;  %19 = sbr.rel (!%p17_p5) target bundleno = 6 (0x6), region = 105 }
 0x562   :  { %1498 = vsyncpa [#allocation4], 1 }
 0x563   :  { %1500 = vsyncpa [#allocation4 + $0x1], 1 }
 0x564   :  { %1501 = vsyncpa [#allocation7], 1 }
 0x565   :  { %1503 = vsyncpa [#allocation7 + $0x1], 1 }
 0x566   :  { %1504 = vsyncpa [#allocation5], 1 }
 0x567   :  { %1506 = vsyncpa [#allocation5 + $0x1], 1 }

</bundles_post_ra>
